<compile_context>
chip_gen: v7x
topology: tpu7x:2x2x1
jax: 0.10.0
libtpu: 0.0.40
codegen_flags: <defaults>
</compile_context>

<pallas_src>
import functools

import jax
import jax.numpy as jnp
from jax.experimental import pallas as pl
from jax.experimental.pallas import tpu as pltpu


# -----------------------------------------------------------------------------
# Pallas kernel: fused 4-layer MLP head (BN folded into Linear weights)
# -----------------------------------------------------------------------------
def _rater_head_kernel(
    x_ref,                         # [tb, 1280] bf16 feature tile
    w1_ref, b1_ref,                # [1280, 512] bf16 / [1, 512] f32
    w2_ref, b2_ref,                # [512, 256]  bf16 / [1, 256] f32
    w3_ref, b3_ref,                # [256, 128]  bf16 / [1, 128] f32
    w4_ref, b4_ref,                # [8, 128]    bf16 (row 0 real) / [1, 1] f32
    o_ref,                         # [1, 1, tb]  f32 (lane-dense row)
):
    def lin_silu(h_bf16, w_ref, b_ref):
        # MXU matmul: bf16 x bf16 -> f32 accumulate; BN folded, Dropout = id.
        z = jnp.dot(h_bf16, w_ref[...],
                    preferred_element_type=jnp.float32) + b_ref[...]
        # SiLU(x) = x * sigmoid(x); epilogue kept in f32 (no bf16 VPU on v5e).
        return z * jax.nn.sigmoid(z)

    h = lin_silu(x_ref[...], w1_ref, b1_ref)                 # [tb, 512] f32
    h = lin_silu(h.astype(jnp.bfloat16), w2_ref, b2_ref)     # [tb, 256] f32
    h = lin_silu(h.astype(jnp.bfloat16), w3_ref, b3_ref)     # [tb, 128] f32

    # Final Linear(128 -> 1) computed as w4 @ h^T on the MXU (contraction on
    # the last dim of both operands, like the Q K^T attention pattern), so the
    # result is already a lane-dense (., tb) row -> unmasked stores and one
    # dense writeback DMA per grid step.  w4 is padded to 8 sublanes; only
    # row 0 carries real weights.
    z8 = jax.lax.dot_general(
        w4_ref[...], h.astype(jnp.bfloat16),
        dimension_numbers=(((1,), (1,)), ((), ())),
        preferred_element_type=jnp.float32)                  # [8, tb]
    z = z8[0:1, :] + b4_ref[...]                             # [1, tb]
    o_ref[...] = jax.nn.sigmoid(z).reshape(o_ref.shape)


def _resident_spec(shape):
    """Whole array as one VMEM block, constant across the batch grid."""
    ndim = len(shape)
    return pl.BlockSpec(shape, lambda i: (0,) * ndim)


def _round_up(x, m):
    return ((x + m - 1) // m) * m


def _pick_tile_b(b):
    # >= 2 grid steps when the batch is big enough (keeps both v7x TCs busy),
    # tile a multiple of 8 (sublane), capped at 1024 rows (fits the 32 MiB
    # scoped-VMEM limit below on every chip generation).
    half = _round_up(max((b + 1) // 2, 1), 8)
    return int(max(8, min(1024, half)))


@functools.partial(jax.jit, static_argnames=("tile_b",))
def rater_head_pallas(feats, params, *, tile_b=None):
    """feats: [B, 1280] features from the (frozen) backbone.

    Features are consumed in bf16; ideally the backbone emits bf16 directly so
    the cast below is a no-op (a wrapper-side f32->bf16 cast would otherwise
    cost an extra HBM round trip).
    """
    B, F = feats.shape
    assert F == 1280, F
    (w1, b1, w2, b2, w3, b3, w4p, b4) = params

    feats = feats.astype(jnp.bfloat16)

    if tile_b is None:
        tile_b = _pick_tile_b(B)
    assert tile_b % 8 == 0 and tile_b > 0, tile_b

    # Ragged batches: zero-pad rows up to a tile multiple, slice off at the end.
    Bp = _round_up(B, tile_b)
    if Bp != B:
        feats = jnp.pad(feats, ((0, Bp - B), (0, 0)))
    num_tiles = Bp // tile_b
    grid = (num_tiles,)

    flops = 2 * Bp * (1280 * 512 + 512 * 256 + 256 * 128 + 128 * 1)
    transcendentals = Bp * (512 + 256 + 128 + 1)     # sigmoids (SiLU + final)
    bytes_accessed = (
        sum(int(a.size) * a.dtype.itemsize for a in params)
        + int(feats.size) * feats.dtype.itemsize
        + Bp * 4
    )

    out = pl.pallas_call(
        _rater_head_kernel,
        out_shape=jax.ShapeDtypeStruct((num_tiles, 1, tile_b), jnp.float32),
        grid=grid,
        in_specs=[
            pl.BlockSpec((tile_b, 1280), lambda i: (i, 0)),   # bf16 feats tile
            _resident_spec(w1.shape), _resident_spec(b1.shape),
            _resident_spec(w2.shape), _resident_spec(b2.shape),
            _resident_spec(w3.shape), _resident_spec(b3.shape),
            _resident_spec(w4p.shape), _resident_spec(b4.shape),
        ],
        # Lane-dense output row per grid step (block == array in last 2 dims).
        out_specs=pl.BlockSpec((1, 1, tile_b), lambda i: (i, 0, 0)),
        compiler_params=pltpu.CompilerParams(
            dimension_semantics=("parallel",),
            # 1024-row bf16 tiles + resident weights + f32 intermediates are
            # ~12-15 MiB: above v5e's 16 MiB default scoped VMEM, well inside
            # 32 MiB everywhere (and far under v7x's 64 MiB physical per TC).
            vmem_limit_bytes=32 * 1024 * 1024,
        ),
        cost_estimate=pl.CostEstimate(
            flops=flops,
            transcendentals=transcendentals,
            bytes_accessed=bytes_accessed),
    )(feats, w1, b1, w2, b2, w3, b3, w4p, b4)

    return out.reshape(Bp, 1)[:B]


# -----------------------------------------------------------------------------
# Deterministic parameter construction (synthetic, matching module shapes)
# BN folded into the Linear layers; weight matrices quantized to bf16.
# -----------------------------------------------------------------------------
def make_params(key):
    dims = [1280, 512, 256, 128]
    eps = 1e-5
    keys = jax.random.split(key, 20)
    ki = iter(range(20))

    params = []
    for li in range(3):  # three Linear + BN + SiLU blocks
        fin, fout = dims[li], dims[li + 1]
        w = jax.random.normal(keys[next(ki)], (fin, fout), jnp.float32) * 0.02
        b = jax.random.normal(keys[next(ki)], (1, fout), jnp.float32) * 0.02
        gamma = 1.0 + 0.1 * jax.random.normal(keys[next(ki)], (1, fout), jnp.float32)
        beta = 0.1 * jax.random.normal(keys[next(ki)], (1, fout), jnp.float32)
        rmean = 0.1 * jax.random.normal(keys[next(ki)], (1, fout), jnp.float32)
        rvar = jnp.abs(jax.random.normal(keys[next(ki)], (1, fout), jnp.float32)) + 0.5
        scale = gamma / jnp.sqrt(rvar + eps)     # folded BN (inference)
        shift = beta - rmean * scale
        w_folded = (w * scale).astype(jnp.bfloat16)   # BN folded into weights
        b_folded = b * scale + shift                  # f32 epilogue bias
        params += [w_folded, b_folded]

    # Final Linear(128 -> 1): stored as a sublane-padded (8, 128) bf16 block;
    # only row 0 carries the real weights (rows 1..7 are zero and unused).
    w4 = jax.random.normal(keys[next(ki)], (1, 128), jnp.float32) * 0.02
    b4 = jax.random.normal(keys[next(ki)], (1, 1), jnp.float32) * 0.02
    w4_pad = jnp.zeros((8, 128), jnp.float32).at[0:1, :].set(w4).astype(jnp.bfloat16)
    params += [w4_pad, b4]
    return tuple(params)


# -----------------------------------------------------------------------------
# Pure-JAX reference for correctness checking (same bf16 casts as the kernel)
# -----------------------------------------------------------------------------
def rater_head_ref(feats, params):
    (w1, b1, w2, b2, w3, b3, w4p, b4) = params

    def blk(h_bf16, w, b):
        z = jnp.dot(h_bf16, w, preferred_element_type=jnp.float32) + b
        return z * jax.nn.sigmoid(z)

    h = blk(feats.astype(jnp.bfloat16), w1, b1)
    h = blk(h.astype(jnp.bfloat16), w2, b2)
    h = blk(h.astype(jnp.bfloat16), w3, b3)
    z = jnp.dot(h.astype(jnp.bfloat16), w4p[0:1, :].T,
                preferred_element_type=jnp.float32) + b4
    return jax.nn.sigmoid(z)


if __name__ == "__main__":
    key = jax.random.PRNGKey(0)
    k_feat, k_par = jax.random.split(key)

    # Synthetic backbone features: output of EfficientNet (classifier=Identity)
    # after x.view(x.size(0), -1)  ->  [B, 1280], emitted in bf16.
    # B=12 exercises both the multi-step grid (tile_b=8 -> 2 steps) and the
    # ragged-batch padding path (padded to 16 rows).
    B = 12
    feats = jax.random.normal(k_feat, (B, 1280), jnp.float32).astype(jnp.bfloat16)
    params = make_params(k_par)

    out = rater_head_pallas(feats, params)
    out = jax.block_until_ready(out)

    ref = rater_head_ref(feats, params)
    assert out.shape == (B, 1), out.shape
    assert jnp.allclose(out, ref, atol=2e-3, rtol=2e-3), (
        float(jnp.max(jnp.abs(out - ref)))
    )
    print("KERNEL_OK")
</pallas_src>

<mosaic_0001>
module attributes {stable_mosaic.version = 11 : i64} {
  func.func @_rater_head_kernel(%arg0: i32, %arg1: memref<8x1280xbf16, #tpu.memory_space<vmem>>, %arg2: memref<1280x512xbf16, #tpu.memory_space<vmem>>, %arg3: memref<1x512xf32, #tpu.memory_space<vmem>>, %arg4: memref<512x256xbf16, #tpu.memory_space<vmem>>, %arg5: memref<1x256xf32, #tpu.memory_space<vmem>>, %arg6: memref<256x128xbf16, #tpu.memory_space<vmem>>, %arg7: memref<1x128xf32, #tpu.memory_space<vmem>>, %arg8: memref<8x128xbf16, #tpu.memory_space<vmem>>, %arg9: memref<1x1xf32, #tpu.memory_space<vmem>>, %arg10: memref<1x1x8xf32, #tpu.memory_space<vmem>>) attributes {dimension_semantics = [#tpu.dimension_semantics<parallel>], iteration_bounds = array<i64: 2>, scalar_prefetch = 0 : i64, scratch_operands = 0 : i64, tpu.core_type = #tpu.core_type<tc>, window_params = [{transform_indices = @transform_0, window_bounds = array<i64: 8, 1280>}, {pipeline_mode = #tpu.pipeline_mode<synchronous>, transform_indices = @transform_1, window_bounds = array<i64: 1280, 512>}, {pipeline_mode = #tpu.pipeline_mode<synchronous>, transform_indices = @transform_2, window_bounds = array<i64: 1, 512>}, {pipeline_mode = #tpu.pipeline_mode<synchronous>, transform_indices = @transform_3, window_bounds = array<i64: 512, 256>}, {pipeline_mode = #tpu.pipeline_mode<synchronous>, transform_indices = @transform_4, window_bounds = array<i64: 1, 256>}, {pipeline_mode = #tpu.pipeline_mode<synchronous>, transform_indices = @transform_5, window_bounds = array<i64: 256, 128>}, {pipeline_mode = #tpu.pipeline_mode<synchronous>, transform_indices = @transform_6, window_bounds = array<i64: 1, 128>}, {pipeline_mode = #tpu.pipeline_mode<synchronous>, transform_indices = @transform_7, window_bounds = array<i64: 8, 128>}, {pipeline_mode = #tpu.pipeline_mode<synchronous>, transform_indices = @transform_8, window_bounds = array<i64: 1, 1>}, {transform_indices = @transform_9, window_bounds = array<i64: 1, 1, 8>}]} {
    %c0 = arith.constant 0 : index
    %c0_0 = arith.constant 0 : index
    %0 = vector.load %arg1[%c0, %c0_0] : memref<8x1280xbf16, #tpu.memory_space<vmem>>, vector<8x1280xbf16>
    %c0_1 = arith.constant 0 : index
    %c0_2 = arith.constant 0 : index
    %1 = vector.load %arg2[%c0_1, %c0_2] : memref<1280x512xbf16, #tpu.memory_space<vmem>>, vector<1280x512xbf16>
    %cst = arith.constant dense<0.000000e+00> : vector<8x512xf32>
    %2 = tpu.matmul %0, %1, %cst {dimension_numbers = #tpu.dot_dimension_numbers<[1], [0], [0], [1], [0, 0, 1, 1], [], []>} : vector<8x1280xbf16>, vector<1280x512xbf16>, vector<8x512xf32> -> vector<8x512xf32>
    %c0_3 = arith.constant 0 : index
    %c0_4 = arith.constant 0 : index
    %3 = vector.load %arg3[%c0_3, %c0_4] : memref<1x512xf32, #tpu.memory_space<vmem>>, vector<1x512xf32>
    %4 = vector.broadcast %3 : vector<1x512xf32> to vector<8x512xf32>
    %5 = arith.addf %2, %4 : vector<8x512xf32>
    %6 = arith.negf %5 : vector<8x512xf32>
    %7 = math.exp %6 : vector<8x512xf32>
    %cst_5 = arith.constant 1.000000e+00 : f32
    %8 = vector.broadcast %cst_5 : f32 to vector<8x512xf32>
    %9 = arith.addf %8, %7 : vector<8x512xf32>
    %10 = arith.divf %8, %9 : vector<8x512xf32>
    %11 = arith.mulf %5, %10 : vector<8x512xf32>
    %12 = arith.truncf %11 : vector<8x512xf32> to vector<8x512xbf16>
    %c0_6 = arith.constant 0 : index
    %c0_7 = arith.constant 0 : index
    %13 = vector.load %arg4[%c0_6, %c0_7] : memref<512x256xbf16, #tpu.memory_space<vmem>>, vector<512x256xbf16>
    %cst_8 = arith.constant dense<0.000000e+00> : vector<8x256xf32>
    %14 = tpu.matmul %12, %13, %cst_8 {dimension_numbers = #tpu.dot_dimension_numbers<[1], [0], [0], [1], [0, 0, 1, 1], [], []>} : vector<8x512xbf16>, vector<512x256xbf16>, vector<8x256xf32> -> vector<8x256xf32>
    %c0_9 = arith.constant 0 : index
    %c0_10 = arith.constant 0 : index
    %15 = vector.load %arg5[%c0_9, %c0_10] : memref<1x256xf32, #tpu.memory_space<vmem>>, vector<1x256xf32>
    %16 = vector.broadcast %15 : vector<1x256xf32> to vector<8x256xf32>
    %17 = arith.addf %14, %16 : vector<8x256xf32>
    %18 = arith.negf %17 : vector<8x256xf32>
    %19 = math.exp %18 : vector<8x256xf32>
    %cst_11 = arith.constant 1.000000e+00 : f32
    %20 = vector.broadcast %cst_11 : f32 to vector<8x256xf32>
    %21 = arith.addf %20, %19 : vector<8x256xf32>
    %22 = arith.divf %20, %21 : vector<8x256xf32>
    %23 = arith.mulf %17, %22 : vector<8x256xf32>
    %24 = arith.truncf %23 : vector<8x256xf32> to vector<8x256xbf16>
    %c0_12 = arith.constant 0 : index
    %c0_13 = arith.constant 0 : index
    %25 = vector.load %arg6[%c0_12, %c0_13] : memref<256x128xbf16, #tpu.memory_space<vmem>>, vector<256x128xbf16>
    %cst_14 = arith.constant dense<0.000000e+00> : vector<8x128xf32>
    %26 = tpu.matmul %24, %25, %cst_14 {dimension_numbers = #tpu.dot_dimension_numbers<[1], [0], [0], [1], [0, 0, 1, 1], [], []>} : vector<8x256xbf16>, vector<256x128xbf16>, vector<8x128xf32> -> vector<8x128xf32>
    %c0_15 = arith.constant 0 : index
    %c0_16 = arith.constant 0 : index
    %27 = vector.load %arg7[%c0_15, %c0_16] : memref<1x128xf32, #tpu.memory_space<vmem>>, vector<1x128xf32>
    %28 = vector.broadcast %27 : vector<1x128xf32> to vector<8x128xf32>
    %29 = arith.addf %26, %28 : vector<8x128xf32>
    %30 = arith.negf %29 : vector<8x128xf32>
    %31 = math.exp %30 : vector<8x128xf32>
    %cst_17 = arith.constant 1.000000e+00 : f32
    %32 = vector.broadcast %cst_17 : f32 to vector<8x128xf32>
    %33 = arith.addf %32, %31 : vector<8x128xf32>
    %34 = arith.divf %32, %33 : vector<8x128xf32>
    %35 = arith.mulf %29, %34 : vector<8x128xf32>
    %c0_18 = arith.constant 0 : index
    %c0_19 = arith.constant 0 : index
    %36 = vector.load %arg8[%c0_18, %c0_19] : memref<8x128xbf16, #tpu.memory_space<vmem>>, vector<8x128xbf16>
    %37 = arith.truncf %35 : vector<8x128xf32> to vector<8x128xbf16>
    %cst_20 = arith.constant dense<0.000000e+00> : vector<8x8xf32>
    %38 = tpu.matmul %36, %37, %cst_20 {dimension_numbers = #tpu.dot_dimension_numbers<[1], [1], [0], [0], [0, 0, 1, 0], [], []>} : vector<8x128xbf16>, vector<8x128xbf16>, vector<8x8xf32> -> vector<8x8xf32>
    %39 = vector.extract_strided_slice %38 {offsets = [0, 0], sizes = [1, 8], strides = [1, 1]} : vector<8x8xf32> to vector<1x8xf32>
    %c0_21 = arith.constant 0 : index
    %c0_22 = arith.constant 0 : index
    %40 = vector.load %arg9[%c0_21, %c0_22] : memref<1x1xf32, #tpu.memory_space<vmem>>, vector<1x1xf32>
    %41 = vector.broadcast %40 : vector<1x1xf32> to vector<1x8xf32>
    %42 = arith.addf %39, %41 : vector<1x8xf32>
    %43 = arith.negf %42 : vector<1x8xf32>
    %44 = math.exp %43 : vector<1x8xf32>
    %cst_23 = arith.constant 1.000000e+00 : f32
    %45 = vector.broadcast %cst_23 : f32 to vector<1x8xf32>
    %46 = arith.addf %45, %44 : vector<1x8xf32>
    %47 = arith.divf %45, %46 : vector<1x8xf32>
    %48 = vector.shape_cast %47 : vector<1x8xf32> to vector<1x1x8xf32>
    %c0_24 = arith.constant 0 : index
    %c0_25 = arith.constant 0 : index
    %c0_26 = arith.constant 0 : index
    %49 = vector.load %arg10[%c0_24, %c0_25, %c0_26] : memref<1x1x8xf32, #tpu.memory_space<vmem>>, vector<1x1x8xf32>
    tpu.vector_store %arg10[%c0_24, %c0_25, %c0_26], %48 {strides = array<i32>} : memref<1x1x8xf32, #tpu.memory_space<vmem>>, vector<1x1x8xf32>,
    return
  }
  func.func @transform_0(%arg0: i32) -> (i32, i32) {
    %c0_i32 = arith.constant 0 : i32
    %c0_i32_0 = arith.constant 0 : i32
    return %arg0, %c0_i32 : i32, i32
  }
  func.func @transform_1(%arg0: i32) -> (i32, i32) {
    %c0_i32 = arith.constant 0 : i32
    %c0_i32_0 = arith.constant 0 : i32
    %c0_i32_1 = arith.constant 0 : i32
    return %c0_i32, %c0_i32_0 : i32, i32
  }
  func.func @transform_2(%arg0: i32) -> (i32, i32) {
    %c0_i32 = arith.constant 0 : i32
    %c0_i32_0 = arith.constant 0 : i32
    %c0_i32_1 = arith.constant 0 : i32
    return %c0_i32, %c0_i32_0 : i32, i32
  }
  func.func @transform_3(%arg0: i32) -> (i32, i32) {
    %c0_i32 = arith.constant 0 : i32
    %c0_i32_0 = arith.constant 0 : i32
    %c0_i32_1 = arith.constant 0 : i32
    return %c0_i32, %c0_i32_0 : i32, i32
  }
  func.func @transform_4(%arg0: i32) -> (i32, i32) {
    %c0_i32 = arith.constant 0 : i32
    %c0_i32_0 = arith.constant 0 : i32
    %c0_i32_1 = arith.constant 0 : i32
    return %c0_i32, %c0_i32_0 : i32, i32
  }
  func.func @transform_5(%arg0: i32) -> (i32, i32) {
    %c0_i32 = arith.constant 0 : i32
    %c0_i32_0 = arith.constant 0 : i32
    %c0_i32_1 = arith.constant 0 : i32
    return %c0_i32, %c0_i32_0 : i32, i32
  }
  func.func @transform_6(%arg0: i32) -> (i32, i32) {
    %c0_i32 = arith.constant 0 : i32
    %c0_i32_0 = arith.constant 0 : i32
    %c0_i32_1 = arith.constant 0 : i32
    return %c0_i32, %c0_i32_0 : i32, i32
  }
  func.func @transform_7(%arg0: i32) -> (i32, i32) {
    %c0_i32 = arith.constant 0 : i32
    %c0_i32_0 = arith.constant 0 : i32
    %c0_i32_1 = arith.constant 0 : i32
    return %c0_i32, %c0_i32_0 : i32, i32
  }
  func.func @transform_8(%arg0: i32) -> (i32, i32) {
    %c0_i32 = arith.constant 0 : i32
    %c0_i32_0 = arith.constant 0 : i32
    %c0_i32_1 = arith.constant 0 : i32
    return %c0_i32, %c0_i32_0 : i32, i32
  }
  func.func @transform_9(%arg0: i32) -> (i32, i32, i32) {
    %c0_i32 = arith.constant 0 : i32
    %c0_i32_0 = arith.constant 0 : i32
    %c0_i32_1 = arith.constant 0 : i32
    return %arg0, %c0_i32, %c0_i32_0 : i32, i32, i32
  }
}

</mosaic_0001>

<bundles_post_ra>
// kernel: rater_head_pallas.1
= control target key start
LH: loop header
LB: loop body
LE: loop exit
PB: predicated region body
PF: predicated region fallthrough
CT: control target
= control target key end

     0   :  { %s5536_s0 = inlined_call_operand.vmem [shape: bf16[16,1280], index: 0, kind: input, shape index: {}]   ;;  %s5537_s1 = inlined_call_operand.hbm [shape: bf16[1280,512], index: 1, kind: input, shape index: {}]   ;;  %s5538_s2 = inlined_call_operand.hbm [shape: f32[1,512], index: 2, kind: input, shape index: {}]   ;;  %s5539_s3 = inlined_call_operand.hbm [shape: bf16[512,256], index: 3, kind: input, shape index: {}]   ;;  %s5540_s4 = inlined_call_operand.hbm [shape: f32[1,256], index: 4, kind: input, shape index: {}]   ;;  %s5541_s5 = inlined_call_operand.hbm [shape: bf16[256,128], index: 5, kind: input, shape index: {}]   ;;  %s5542_s6 = inlined_call_operand.hbm [shape: f32[1,128], index: 6, kind: input, shape index: {}]   ;;  %s5543_s7 = inlined_call_operand.hbm [shape: bf16[8,128], index: 7, kind: input, shape index: {}]   ;;  %s5544_s8 = inlined_call_operand.<no memory space> [shape: f32[1,1], index: 8, kind: input, shape index: {}]   ;;  %s5545_s9 = inlined_call_operand.vmem [shape: f32[2,1,8], index: 9, kind: output, shape index: {}]  }
   0x1   :  { %v14_v0 = vstv %s5544_s8 }
   0x2   :  { %15 = vst [vmem:[#allocation2] sm:$0x1] %v14_v0 }
   0x3   :  { %16 = vsyncpa [#allocation4], 0 }
   0x4   :  { %17 = vsyncpa [#allocation6], 0 }
   0x5   :  { %18 = vsyncpa [#allocation9], 0 }
   0x6   :  { %19 = vsyncpa [#allocation12], 0  ;;  %s5227_s11 = smov 0  }
   0x7 LB: > { %s5158_s12 = smov [#allocation5]   ;;  %s5233_s14 = sadd.s32 4294967295, %s5156_s11   ;;  %s5156_s11 = sphi %s5227_s11, %s25_s11  }
   0x8   : > { %s276_s13 = sshll.u32 %s5158_s12, 4  ;;  %p3705_p0 = scmp.ge.s32.totalorder %s5156_s11, 1  ;;  %s5238_s13 = int_to_ptr.vmem [resolvable:$true] %s276_s13 }
   0x9   : > { %p250_p1 = scmp.lt.s32.totalorder %s5156_s11, 3  ;;  %p5546_p2 = scmp.eq.s32.totalorder %s5233_s14, 0 }
   0xa   : > { %s5159_s15 = smov [#allocation8]   ;;  %s5160_s17 = smov [#allocation11]  }
   0xb   : > { %p5240_p3 = pnand %p3705_p0, %p250_p1  ;;  %s300_s16 = sshll.u32 %s5159_s15, 4  ;;  %s5246_s16 = int_to_ptr.vmem [resolvable:$true] %s300_s16 }
   0xc   : > { %s324_s18 = sshll.u32 %s5160_s17, 4  ;;  %s5161_s20 = smov [#allocation3]   ;;  %s5254_s18 = int_to_ptr.vmem [resolvable:$true] %s324_s18 }
   0xd   : > { %s5548_s8 = scalar_select %p5240_p3, 1, 0 }
   0xe   : > { %p4243_p4 = pneg %p5240_p3  ;;  %s262_s21 = sshll.u32 %s5161_s20, 4  ;;  %s5256_s21 = int_to_ptr.vmem [resolvable:$true] %s262_s21 }
   0xf   : > { %s4938_s24 = scalar_lea.hbm %s5538_s2, 64 }
  0x10   : > { %p5250_p5 = pnand %p5546_p2, %p4243_p4  ;;  %p4939_p6 = scmp.ne.s32.totalorder %s5538_s2, %s4938_s24 }
  0x11   : > { %p4945_p10 = scmp.lt.u32.totalorder %s4938_s24, %s5538_s2 }
  0x12   : > { %p5266_p7 = pneg %p5250_p5 }
  0x14   : > { %p4941_p8 = pnand %p5266_p7, %p4939_p6 }
  0x16   : > { %p4942_p9 = pneg %p4941_p8 }
  0x18   : > { %p4947_p11 = pnand %p4945_p10, %p4942_p9 }
  0x1a   : > { %4950 = shalt.err (!%p4947_p11)
}
  0x1b   : > { %s4951_s30 = scalar_lea.vmem %s5238_s13, 64  ;;  %p4959_p1 = scmp.lt.s32.totalorder %s5238_s13, %s5238_s13 }
  0x1c   : > { %p4952_p12 = scmp.ne.s32.totalorder %s5238_s13, %s4951_s30  ;;  %p4960_p4 = scmp.lt.s32.totalorder %s4951_s30, %s4951_s30 }
  0x1e   : > { %p4954_p13 = pnand %p4952_p12, %p5266_p7  ;;  %p4961_p6 = por %p4960_p4, %p4959_p1 }
  0x20   : > { %p4955_p0 = pneg %p4954_p13 }
  0x22   : > { %p4962_p8 = pnand %p4961_p6, %p4955_p0 }
  0x24   : > { %4965 = shalt.err (!%p4962_p8)
}
  0x25   : > { %4249 = dma.hbm_to_vmem [thread:$0]  (!%p5250_p5), %s5538_s2, 64, %s5238_s13, [#allocation6]  }
  0x26   : > { %s4966_s20 = scalar_lea.hbm %s5540_s4, 32 }
  0x27   : > { %p4967_p9 = scmp.ne.s32.totalorder %s5540_s4, %s4966_s20  ;;  %p4973_p12 = scmp.lt.u32.totalorder %s4966_s20, %s5540_s4 }
  0x29   : > { %p4969_p10 = pnand %p4967_p9, %p5266_p7 }
  0x2b   : > { %p4970_p11 = pneg %p4969_p10 }
  0x2d   : > { %p4975_p13 = pnand %p4973_p12, %p4970_p11 }
  0x2f   : > { %4978 = shalt.err (!%p4975_p13)
}
  0x30   : > { %s4979_s13 = scalar_lea.vmem %s5246_s16, 32  ;;  %p4987_p6 = scmp.lt.s32.totalorder %s5246_s16, %s5246_s16 }
  0x31   : > { %p4980_p0 = scmp.ne.s32.totalorder %s5246_s16, %s4979_s13  ;;  %p4988_p8 = scmp.lt.s32.totalorder %s4979_s13, %s4979_s13 }
  0x33   : > { %p4982_p1 = pnand %p4980_p0, %p5266_p7  ;;  %p4989_p9 = por %p4988_p8, %p4987_p6 }
  0x35   : > { %p4983_p4 = pneg %p4982_p1 }
  0x37   : > { %p4990_p10 = pnand %p4989_p9, %p4983_p4 }
  0x39   : > { %4993 = shalt.err (!%p4990_p10)
}
  0x3a   : > { %4255 = dma.hbm_to_vmem [thread:$0]  (!%p5250_p5), %s5540_s4, 32, %s5246_s16, [#allocation9]  }
  0x3b   : > { %s4994_s10 = scalar_lea.hbm %s5542_s6, 16 }
  0x3c   : > { %p4995_p11 = scmp.ne.s32.totalorder %s5542_s6, %s4994_s10  ;;  %p5001_p0 = scmp.lt.u32.totalorder %s4994_s10, %s5542_s6 }
  0x3e   : > { %p4997_p12 = pnand %p4995_p11, %p5266_p7 }
  0x40   : > { %p4998_p13 = pneg %p4997_p12 }
  0x42   : > { %p5003_p1 = pnand %p5001_p0, %p4998_p13 }
  0x44   : > { %5006 = shalt.err (!%p5003_p1)
}
  0x45   : > { %s5007_s16 = scalar_lea.vmem %s5254_s18, 16  ;;  %s5014_s22 = scalar_lea.vmem %s5254_s18, 32 }
  0x46   : > { %p5008_p4 = scmp.ne.s32.totalorder %s5254_s18, %s5007_s16  ;;  %p5015_p9 = scmp.lt.s32.totalorder %s5254_s18, %s5254_s18 }
  0x47   : > { %p5016_p10 = scmp.lt.s32.totalorder %s5014_s22, %s5007_s16 }
  0x48   : > { %p5010_p6 = pnand %p5008_p4, %p5266_p7 }
  0x49   : > { %p5017_p11 = por %p5016_p10, %p5015_p9 }
  0x4a   : > { %p5011_p8 = pneg %p5010_p6 }
  0x4c   : > { %p5018_p12 = pnand %p5017_p11, %p5011_p8 }
  0x4e   : > { %5021 = shalt.err (!%p5018_p12)
}
  0x4f   : > { %4261 = dma.hbm_to_vmem [thread:$0]  (!%p5250_p5), %s5542_s6, 16, %s5254_s18, [#allocation12]  }
  0x50   : > { %s5022_s26 = scalar_lea.hbm %s5537_s1, 40960 }
  0x51   : > { %p5023_p13 = scmp.ne.s32.totalorder %s5537_s1, %s5022_s26  ;;  %p5029_p4 = scmp.lt.u32.totalorder %s5022_s26, %s5537_s1 }
  0x53   : > { %p5025_p0 = pnand %p5023_p13, %p5266_p7 }
  0x55   : > { %p5026_p1 = pneg %p5025_p0 }
  0x57   : > { %p5031_p6 = pnand %p5029_p4, %p5026_p1 }
  0x59   : > { %5034 = shalt.err (!%p5031_p6)
}
  0x5a   : > { %s5035_s18 = scalar_lea.vmem %s5256_s21, 40960  ;;  %p5043_p11 = scmp.lt.s32.totalorder %s5256_s21, %s5256_s21 }
  0x5b   : > { %p5036_p8 = scmp.ne.s32.totalorder %s5256_s21, %s5035_s18  ;;  %p5044_p12 = scmp.lt.s32.totalorder %s5035_s18, %s5035_s18 }
  0x5d   : > { %p5038_p9 = pnand %p5036_p8, %p5266_p7  ;;  %p5045_p13 = por %p5044_p12, %p5043_p11 }
  0x5f   : > { %p5039_p10 = pneg %p5038_p9 }
  0x61   : > { %p5046_p0 = pnand %p5045_p13, %p5039_p10 }
  0x63   : > { %5049 = shalt.err (!%p5046_p0)
}
  0x64   : > { %s5162_s12 = smov 256   ;;  %s5163_s15 = smov 16  }
  0x65   : > { %4246 = dma.hbm_to_vmem [thread:$0]  (!%p5250_p5), %s5537_s1, 40960, %s5256_s21, [#allocation4], %s5162_s12, %s5162_s12, %s5163_s15  }
  0x66   : > { %s5164_s16 = smov [#allocation7]   ;;  %s5050_s25 = scalar_lea.hbm %s5539_s3, 8192 }
  0x67   : > { %s286_s22 = sshll.u32 %s5164_s16, 4  ;;  %p5051_p1 = scmp.ne.s32.totalorder %s5539_s3, %s5050_s25  ;;  %s287_s22 = int_to_ptr.vmem [resolvable:$true] %s286_s22 }
  0x68   : > { %p5057_p8 = scmp.lt.u32.totalorder %s5050_s25, %s5539_s3 }
  0x69   : > { %p5053_p4 = pnand %p5051_p1, %p5266_p7 }
  0x6b   : > { %p5054_p6 = pneg %p5053_p4 }
  0x6d   : > { %p5059_p9 = pnand %p5057_p8, %p5054_p6 }
  0x6f   : > { %5062 = shalt.err (!%p5059_p9)
}
  0x70   : > { %s5063_s21 = scalar_lea.vmem %s287_s22, 8192  ;;  %p5071_p13 = scmp.lt.s32.totalorder %s287_s22, %s287_s22 }
  0x71   : > { %p5064_p10 = scmp.ne.s32.totalorder %s287_s22, %s5063_s21  ;;  %p5072_p0 = scmp.lt.s32.totalorder %s5063_s21, %s5063_s21 }
  0x73   : > { %p5066_p11 = pnand %p5064_p10, %p5266_p7  ;;  %p5073_p2 = por %p5072_p0, %p5071_p13 }
  0x75   : > { %p5067_p12 = pneg %p5066_p11 }
  0x77   : > { %p5074_p3 = pnand %p5073_p2, %p5067_p12 }
  0x79   : > { %5077 = shalt.err (!%p5074_p3)
}
  0x7a   : > { %s5165_s30 = smov 128   ;;  %s5166_s10 = smov 8  }
  0x7b   : > { %4252 = dma.hbm_to_vmem [thread:$0]  (!%p5250_p5), %s5539_s3, 8192, %s287_s22, [#allocation6], %s5165_s30, %s5165_s30, %s5166_s10  }
  0x7c   : > { %s5167_s15 = smov [#allocation10]   ;;  %s5078_s23 = scalar_lea.hbm %s5541_s5, 2048 }
  0x7d   : > { %s310_s17 = sshll.u32 %s5167_s15, 4  ;;  %p5079_p2 = scmp.ne.s32.totalorder %s5541_s5, %s5078_s23  ;;  %s311_s17 = int_to_ptr.vmem [resolvable:$true] %s310_s17 }
  0x7e   : > { %p5085_p4 = scmp.lt.u32.totalorder %s5078_s23, %s5541_s5 }
  0x7f   : > { %p5081_p3 = pnand %p5079_p2, %p5266_p7 }
  0x81   : > { %p5082_p1 = pneg %p5081_p3 }
  0x83   : > { %p5087_p6 = pnand %p5085_p4, %p5082_p1 }
  0x85   : > { %5090 = shalt.err (!%p5087_p6)
}
  0x86   : > { %s5091_s22 = scalar_lea.vmem %s311_s17, 2048  ;;  %p5099_p11 = scmp.lt.s32.totalorder %s311_s17, %s311_s17 }
  0x87   : > { %p5092_p8 = scmp.ne.s32.totalorder %s311_s17, %s5091_s22  ;;  %p5100_p12 = scmp.lt.s32.totalorder %s5091_s22, %s5091_s22 }
  0x89   : > { %p5094_p9 = pnand %p5092_p8, %p5266_p7  ;;  %p5101_p13 = por %p5100_p12, %p5099_p11 }
  0x8b   : > { %p5095_p10 = pneg %p5094_p9 }
  0x8d   : > { %p5102_p0 = pnand %p5101_p13, %p5095_p10 }
  0x8f   : > { %5105 = shalt.err (!%p5102_p0)
}
  0x90   : > { %s5168_s28 = smov 64   ;;  %s5169_s29 = smov 4  }
  0x91   : > { %4258 = dma.hbm_to_vmem [thread:$0]  (!%p5250_p5), %s5541_s5, 2048, %s311_s17, [#allocation9], %s5168_s28, %s5168_s28, %s5169_s29  }
  0x92   : > { %s5170_s10 = smov [#allocation13]   ;;  %s5106_s20 = scalar_lea.hbm %s5543_s7, 64 }
  0x93   : > { %s335_s18 = sshll.u32 %s5170_s10, 4  ;;  %p5107_p2 = scmp.ne.s32.totalorder %s5543_s7, %s5106_s20  ;;  %s336_s18 = int_to_ptr.vmem [resolvable:$true] %s335_s18 }
  0x94   : > { %p5113_p4 = scmp.lt.u32.totalorder %s5106_s20, %s5543_s7 }
  0x95   : > { %p5109_p3 = pnand %p5107_p2, %p5266_p7 }
  0x97   : > { %p5110_p1 = pneg %p5109_p3 }
  0x99   : > { %p5115_p6 = pnand %p5113_p4, %p5110_p1 }
  0x9b   : > { %5118 = shalt.err (!%p5115_p6)
}
  0x9c   : > { %s5119_s17 = scalar_lea.vmem %s336_s18, 64  ;;  %p5127_p11 = scmp.lt.s32.totalorder %s336_s18, %s336_s18 }
  0x9d   : > { %p5120_p8 = scmp.ne.s32.totalorder %s336_s18, %s5119_s17  ;;  %p5128_p12 = scmp.lt.s32.totalorder %s5119_s17, %s5119_s17 }
  0x9f   : > { %p5122_p9 = pnand %p5120_p8, %p5266_p7  ;;  %p5129_p13 = por %p5128_p12, %p5127_p11 }
  0xa1   : > { %p5123_p10 = pneg %p5122_p9 }
  0xa3   : > { %p5130_p0 = pnand %p5129_p13, %p5123_p10 }
  0xa5   : > { %5133 = shalt.err (!%p5130_p0)
}
  0xa6   : > { %4264 = dma.hbm_to_vmem [thread:$0]  (!%p5250_p5), %s5543_s7, 64, %s336_s18, [#allocation12]  }
  0xa7   : > { %p5551_p2 = scmp.ne.s32.totalorder %s5548_s8, 0 }
  0xa8   : > { %p5552_p3 = scmp.eq.s32.totalorder (!%p5551_p2), %s5233_s14, 0 }
  0xa9   : > { %359 = sbr.rel (%p5551_p2) target bundleno = 1558 (0x616), region = 56 }
  0xb0   : > { %5139 = dma.done.wait (%p5552_p3), [#allocation4], 40960   ;;  %p5553_p7 = pmov %p5552_p3 }
  0xb1   : > { %p5554_p1 = pmov %p5552_p3 }
  0xb2   : > { %5141 = vsyncadd (%p5553_p7), [#allocation4], 4294926336 }
  0xb3   : > { %5143 = dma.done.wait (%p5554_p1), [#allocation6], 8256   ;;  %p5555_p4 = pmov %p5554_p1 }
  0xb4   : > { %p5556_p6 = pmov %p5554_p1 }
  0xb5   : > { %5145 = vsyncadd (%p5555_p4), [#allocation6], 4294959040 }
  0xb6   : > { %5147 = dma.done.wait (%p5556_p6), [#allocation9], 2080   ;;  %p5557_p5 = pmov %p5554_p1 }
  0xb7   : > { %p5558_p8 = pmov %p5554_p1 }
  0xb8   : > { %5149 = vsyncadd (%p5557_p5), [#allocation9], 4294965216 }
  0xb9   : > { %5151 = dma.done.wait (%p5558_p8), [#allocation12], 80   ;;  %p5559_p9 = pmov %p5554_p1 }
  0xba   : > { %v4304_v1 = vld [vmem:[#allocation3 + $0x4] ss:$16 sps:$4 sm:$0xff]   ;;  %v4308_v3 = vld [vmem:[#allocation3] ss:$16 sps:$4 sm:$0xff]   ;;  %p417_p10 = scmp.lt.s32.totalorder %s5233_s14, 1  ;;  %vm5172_vm0 = vmmov 0  }
  0xbb   : > { %5153 = vsyncadd (%p5559_p9), [#allocation12], 4294967216  ;;  %v4306_v2 = vld [vmem:[#allocation3 + $0x204] ss:$16 sps:$4 sm:$0xff]   ;;  %2408 = vmatprep.subr.bf16.mxu1 %v4304_v1  ;;  %v4309_v4 = vld [vmem:[#allocation3 + $0x200] ss:$16 sps:$4 sm:$0xff]  }
  0xbc   : > { %2449 = vmatprep.subr.bf16.mxu0 %v4306_v2  ;;  %v4310_v5 = vld [vmem:[#allocation3 + $0x24] ss:$16 sps:$4 sm:$0xff]   ;;  %2409 = vmatpush1.bf16.msra.mxu1 %v4308_v3  ;;  %v4314_v7 = vld [vmem:[#allocation3 + $0x20] ss:$16 sps:$4 sm:$0xff]   ;;  %s5561_s14 = smov (!%p417_p10, %s5233_s14), 1  ;;  %vm3585_vm1 = vcmask 57344  }
  0xbd   : > { %2450 = vmatpush1.bf16.msra.mxu0 %v4309_v4  ;;  %v4312_v6 = vld [vmem:[#allocation3 + $0x224] ss:$16 sps:$4 sm:$0xff]   ;;  %2410 = vmatprep.subr.bf16.mxu1 %v4310_v5  ;;  %v4315_v8 = vld [vmem:[#allocation3 + $0x220] ss:$16 sps:$4 sm:$0xff]   ;;  %s4214_s8 = smul.u32 40, %s5561_s14  ;;  %s424_s21 = scalar_lea.vmem %s5545_s9, %s5561_s14 }
  0xbe   : > { %2451 = vmatprep.subr.bf16.mxu0 %v4312_v6  ;;  %v4316_v9 = vld [vmem:[#allocation3 + $0x44] ss:$16 sps:$4 sm:$0xff]   ;;  %v4320_v11 = vld [vmem:[#allocation3 + $0x40] ss:$16 sps:$4 sm:$0xff]   ;;  %v4409_v6 = vld [vmem:[#allocation3 + $0xc] ss:$16 sps:$4 sm:$0xff]  }
  0xbf   : > { %v4318_v10 = vld [vmem:[#allocation3 + $0x244] ss:$16 sps:$4 sm:$0xff]   ;;  %v4321_v12 = vld [vmem:[#allocation3 + $0x240] ss:$16 sps:$4 sm:$0xff]   ;;  %s5437_s22 = scalar_lea.vmem %s5536_s0, %s4214_s8 }
  0xc0   : > { %2411 = vmatpush1.bf16.msra.mxu1 %v4314_v7  ;;  %v4322_v13 = vld [vmem:[#allocation3 + $0x64] ss:$16 sps:$4 sm:$0xff]   ;;  %v4326_v15 = vld [vmem:[#allocation3 + $0x60] ss:$16 sps:$4 sm:$0xff]  }
  0xc1   : > { %2452 = vmatpush1.bf16.msra.mxu0 %v4315_v8  ;;  %2412 = vmatprep.subr.bf16.mxu1 %v4316_v9  ;;  %v4324_v14 = vld [vmem:[#allocation3 + $0x264] ss:$16 sps:$4 sm:$0xff]   ;;  %v4327_v16 = vld [vmem:[#allocation3 + $0x260] ss:$16 sps:$4 sm:$0xff]  }
  0xc2   : > { %2453 = vmatprep.subr.bf16.mxu0 %v4318_v10  ;;  %v4328_v17 = vld [vmem:[#allocation3 + $0x84] ss:$16 sps:$4 sm:$0xff]   ;;  %v4332_v19 = vld [vmem:[#allocation3 + $0x80] ss:$16 sps:$4 sm:$0xff]   ;;  %v4407_v10 = vld [vmem:[#allocation3 + $0x8] ss:$16 sps:$4 sm:$0xff]  }
  0xc3   : > { %v4330_v18 = vld [vmem:[#allocation3 + $0x284] ss:$16 sps:$4 sm:$0xff]   ;;  %v4333_v20 = vld [vmem:[#allocation3 + $0x280] ss:$16 sps:$4 sm:$0xff]  }
  0xc4   : > { %2413 = vmatpush1.bf16.msra.mxu1 %v4320_v11  ;;  %v4334_v21 = vld [vmem:[#allocation3 + $0xa4] ss:$16 sps:$4 sm:$0xff]   ;;  %v4338_v23 = vld [vmem:[#allocation3 + $0xa0] ss:$16 sps:$4 sm:$0xff]  }
  0xc5   : > { %2454 = vmatpush1.bf16.msra.mxu0 %v4321_v12  ;;  %2414 = vmatprep.subr.bf16.mxu1 %v4322_v13  ;;  %v4336_v22 = vld [vmem:[#allocation3 + $0x2a4] ss:$16 sps:$4 sm:$0xff]   ;;  %v4339_v24 = vld [vmem:[#allocation3 + $0x2a0] ss:$16 sps:$4 sm:$0xff]   ;;  %v4415_v12 = vld [vmem:[#allocation3 + $0x2c] ss:$16 sps:$4 sm:$0xff]  }
  0xc6   : > { %2455 = vmatprep.subr.bf16.mxu0 %v4324_v14  ;;  %v4340_v25 = vld [vmem:[#allocation3 + $0xc4] ss:$16 sps:$4 sm:$0xff]   ;;  %v4344_v27 = vld [vmem:[#allocation3 + $0xc0] ss:$16 sps:$4 sm:$0xff]   ;;  %v4413_v14 = vld [vmem:[#allocation3 + $0x28] ss:$16 sps:$4 sm:$0xff]  }
  0xc7   : > { %v4342_v26 = vld [vmem:[#allocation3 + $0x2c4] ss:$16 sps:$4 sm:$0xff]   ;;  %v4345_v28 = vld [vmem:[#allocation3 + $0x2c0] ss:$16 sps:$4 sm:$0xff]  }
  0xc8   : > { %2415 = vmatpush1.bf16.msra.mxu1 %v4326_v15  ;;  %v4346_v29 = vld [vmem:[#allocation3 + $0xe4] ss:$16 sps:$4 sm:$0xff]   ;;  %v4350_v31 = vld [vmem:[#allocation3 + $0xe0] ss:$16 sps:$4 sm:$0xff]  }
  0xc9   : > { %2456 = vmatpush1.bf16.msra.mxu0 %v4327_v16  ;;  %2416 = vmatprep.subr.bf16.mxu1 %v4328_v17  ;;  %v4348_v30 = vld [vmem:[#allocation3 + $0x2e4] ss:$16 sps:$4 sm:$0xff]   ;;  %v4351_v32 = vld [vmem:[#allocation3 + $0x2e0] ss:$16 sps:$4 sm:$0xff]   ;;  %v4421_v16 = vld [vmem:[#allocation3 + $0x4c] ss:$16 sps:$4 sm:$0xff]  }
  0xca   : > { %2457 = vmatprep.subr.bf16.mxu0 %v4330_v18  ;;  %v4352_v33 = vld [vmem:[#allocation3 + $0x104] ss:$16 sps:$4 sm:$0xff]   ;;  %v4356_v35 = vld [vmem:[#allocation3 + $0x100] ss:$16 sps:$4 sm:$0xff]   ;;  %v4419_v18 = vld [vmem:[#allocation3 + $0x48] ss:$16 sps:$4 sm:$0xff]  }
  0xcb   : > { %v4354_v34 = vld [vmem:[#allocation3 + $0x304] ss:$16 sps:$4 sm:$0xff]   ;;  %v4357_v36 = vld [vmem:[#allocation3 + $0x300] ss:$16 sps:$4 sm:$0xff]  }
  0xcc   : > { %2417 = vmatpush1.bf16.msra.mxu1 %v4332_v19  ;;  %v4358_v37 = vld [vmem:[#allocation3 + $0x124] ss:$16 sps:$4 sm:$0xff]   ;;  %v4362_v39 = vld [vmem:[#allocation3 + $0x120] ss:$16 sps:$4 sm:$0xff]  }
  0xcd   : > { %2458 = vmatpush1.bf16.msra.mxu0 %v4333_v20  ;;  %2418 = vmatprep.subr.bf16.mxu1 %v4334_v21  ;;  %v4360_v38 = vld [vmem:[#allocation3 + $0x324] ss:$16 sps:$4 sm:$0xff]   ;;  %v4363_v40 = vld [vmem:[#allocation3 + $0x320] ss:$16 sps:$4 sm:$0xff]   ;;  %v4427_v20 = vld [vmem:[#allocation3 + $0x6c] ss:$16 sps:$4 sm:$0xff]  }
  0xce   : > { %2459 = vmatprep.subr.bf16.mxu0 %v4336_v22  ;;  %v4364_v41 = vld [vmem:[#allocation3 + $0x144] ss:$16 sps:$4 sm:$0xff]   ;;  %v4368_v43 = vld [vmem:[#allocation3 + $0x140] ss:$16 sps:$4 sm:$0xff]   ;;  %v4425_v22 = vld [vmem:[#allocation3 + $0x68] ss:$16 sps:$4 sm:$0xff]  }
  0xcf   : > { %v4366_v42 = vld [vmem:[#allocation3 + $0x344] ss:$16 sps:$4 sm:$0xff]   ;;  %v4369_v44 = vld [vmem:[#allocation3 + $0x340] ss:$16 sps:$4 sm:$0xff]  }
  0xd0   : > { %2419 = vmatpush1.bf16.msra.mxu1 %v4338_v23  ;;  %v4370_v45 = vld [vmem:[#allocation3 + $0x164] ss:$16 sps:$4 sm:$0xff]   ;;  %v4374_v50 = vld [vmem:[#allocation3 + $0x160] ss:$16 sps:$4 sm:$0xff]  }
  0xd1   : > { %2460 = vmatpush1.bf16.msra.mxu0 %v4339_v24  ;;  %2420 = vmatprep.subr.bf16.mxu1 %v4340_v25  ;;  %v4372_v46 = vld [vmem:[#allocation3 + $0x364] ss:$16 sps:$4 sm:$0xff]   ;;  %v4375_v51 = vld [vmem:[#allocation3 + $0x360] ss:$16 sps:$4 sm:$0xff]   ;;  %v4433_v24 = vld [vmem:[#allocation3 + $0x8c] ss:$16 sps:$4 sm:$0xff]  }
  0xd2   : > { %2461 = vmatprep.subr.bf16.mxu0 %v4342_v26  ;;  %v426_v47 = vld [vmem:[%s5437_s22] sm:$0xff]  ;;  %v427_v49 = vld [vmem:[%s5437_s22 + $0x8] sm:$0xff] }
  0xd3   : > { %v5440_v48 = vcombine.high %v426_v47, %v426_v47  ;;  %v5443_v52 = vcombine.high %v427_v49, %v427_v49  ;;  %v4376_v53 = vld [vmem:[#allocation3 + $0x184] ss:$16 sps:$4 sm:$0xff]   ;;  %v4380_v55 = vld [vmem:[#allocation3 + $0x180] ss:$16 sps:$4 sm:$0xff]   ;;  %v5447_v7 = vcombine.low %v426_v47, %v426_v47  ;;  %v5449_v8 = vcombine.low %v427_v49, %v427_v49  ;;  %v4431_v26 = vld [vmem:[#allocation3 + $0x88] ss:$16 sps:$4 sm:$0xff]  }
  0xd4   : > { %2421 = vmatpush1.bf16.msra.mxu1 %v4344_v27  ;;  %v4378_v54 = vld [vmem:[#allocation3 + $0x384] ss:$16 sps:$4 sm:$0xff]   ;;  %v4381_v56 = vld [vmem:[#allocation3 + $0x380] ss:$16 sps:$4 sm:$0xff]  }
  0xd5   : > { %2462 = vmatpush1.bf16.msra.mxu0 %v4345_v28  ;;  %2422 = vmatprep.subr.bf16.mxu1 %v4346_v29  ;;  %v4382_v57 = vld [vmem:[#allocation3 + $0x1a4] ss:$16 sps:$4 sm:$0xff]   ;;  %v4386_v59 = vld [vmem:[#allocation3 + $0x1a0] ss:$16 sps:$4 sm:$0xff]   ;;  %v4439_v28 = vld [vmem:[#allocation3 + $0xac] ss:$16 sps:$4 sm:$0xff]  }
  0xd6   : > { %2463 = vmatprep.subr.bf16.mxu0 %v4348_v30  ;;  %2440 = vmatprep.mubr.bf16.mxu1 %v5440_v48  ;;  %v4384_v58 = vld [vmem:[#allocation3 + $0x3a4] ss:$16 sps:$4 sm:$0xff]   ;;  %v4387_v60 = vld [vmem:[#allocation3 + $0x3a0] ss:$16 sps:$4 sm:$0xff]   ;;  %v4437_v30 = vld [vmem:[#allocation3 + $0xa8] ss:$16 sps:$4 sm:$0xff]  }
  0xd7   : > { %2481 = vmatprep.mubr.bf16.mxu0 %v5443_v52  ;;  %v4388_v61 = vld [vmem:[#allocation3 + $0x1c4] ss:$16 sps:$4 sm:$0xff]   ;;  %v4392_v63 = vld [vmem:[#allocation3 + $0x1c0] ss:$16 sps:$4 sm:$0xff]  }
  0xd8   : > { %2423 = vmatpush1.bf16.msra.mxu1 %v4350_v31  ;;  %v4390_v62 = vld [vmem:[#allocation3 + $0x3c4] ss:$16 sps:$4 sm:$0xff]   ;;  %v4393_v0 = vld [vmem:[#allocation3 + $0x3c0] ss:$16 sps:$4 sm:$0xff]  }
  0xd9   : > { %2464 = vmatpush1.bf16.msra.mxu0 %v4351_v32  ;;  %2424 = vmatprep.subr.bf16.mxu1 %v4352_v33  ;;  %v4394_v1 = vld [vmem:[#allocation3 + $0x1e4] ss:$16 sps:$4 sm:$0xff]   ;;  %v4398_v3 = vld [vmem:[#allocation3 + $0x1e0] ss:$16 sps:$4 sm:$0xff]   ;;  %v4445_v32 = vld [vmem:[#allocation3 + $0xcc] ss:$16 sps:$4 sm:$0xff]  }
  0xda   : > { %2465 = vmatprep.subr.bf16.mxu0 %v4354_v34  ;;  %v4396_v2 = vld [vmem:[#allocation3 + $0x3e4] ss:$16 sps:$4 sm:$0xff]   ;;  %v4399_v4 = vld [vmem:[#allocation3 + $0x3e0] ss:$16 sps:$4 sm:$0xff]  }
  0xdb   : > { %v4406_v5 = vld [vmem:[#allocation3 + $0x404] ss:$16 sps:$4 sm:$0xff]   ;;  %v4404_v9 = vld [vmem:[#allocation3 + $0x400] ss:$16 sps:$4 sm:$0xff]  }
  0xdc   : > { %2425 = vmatpush1.bf16.msra.mxu1 %v4356_v35  ;;  %v4412_v11 = vld [vmem:[#allocation3 + $0x424] ss:$16 sps:$4 sm:$0xff]   ;;  %v4410_v13 = vld [vmem:[#allocation3 + $0x420] ss:$16 sps:$4 sm:$0xff]  }
  0xdd   : > { %2466 = vmatpush1.bf16.msra.mxu0 %v4357_v36  ;;  %2426 = vmatprep.subr.bf16.mxu1 %v4358_v37  ;;  %v4418_v15 = vld [vmem:[#allocation3 + $0x444] ss:$16 sps:$4 sm:$0xff]   ;;  %v4416_v17 = vld [vmem:[#allocation3 + $0x440] ss:$16 sps:$4 sm:$0xff]   ;;  %v4443_v36 = vld [vmem:[#allocation3 + $0xc8] ss:$16 sps:$4 sm:$0xff]  }
  0xde   : > { %2467 = vmatprep.subr.bf16.mxu0 %v4360_v38  ;;  %v4424_v19 = vld [vmem:[#allocation3 + $0x464] ss:$16 sps:$4 sm:$0xff]   ;;  %v4422_v21 = vld [vmem:[#allocation3 + $0x460] ss:$16 sps:$4 sm:$0xff]   ;;  %v4451_v38 = vld [vmem:[#allocation3 + $0xec] ss:$16 sps:$4 sm:$0xff]  }
  0xdf   : > { %v4430_v23 = vld [vmem:[#allocation3 + $0x484] ss:$16 sps:$4 sm:$0xff]   ;;  %v4428_v25 = vld [vmem:[#allocation3 + $0x480] ss:$16 sps:$4 sm:$0xff]  }
  0xe0   : > { %2427 = vmatpush1.bf16.msra.mxu1 %v4362_v39  ;;  %v4436_v27 = vld [vmem:[#allocation3 + $0x4a4] ss:$16 sps:$4 sm:$0xff]   ;;  %v4434_v29 = vld [vmem:[#allocation3 + $0x4a0] ss:$16 sps:$4 sm:$0xff]  }
  0xe1   : > { %2468 = vmatpush1.bf16.msra.mxu0 %v4363_v40  ;;  %2428 = vmatprep.subr.bf16.mxu1 %v4364_v41  ;;  %v4442_v31 = vld [vmem:[#allocation3 + $0x4c4] ss:$16 sps:$4 sm:$0xff]   ;;  %v4440_v34 = vld [vmem:[#allocation3 + $0x4c0] ss:$16 sps:$4 sm:$0xff]   ;;  %v4449_v40 = vld [vmem:[#allocation3 + $0xe8] ss:$16 sps:$4 sm:$0xff]  }
  0xe2   : > { %2469 = vmatprep.subr.bf16.mxu0 %v4366_v42  ;;  %v5455_v33 = vld [vmem:[%s5437_s22 + $0x10] sm:$0xff] }
  0xe3   : > { %v5459_v35 = vcombine.high %v5455_v33, %v5455_v33  ;;  %v4448_v37 = vld [vmem:[#allocation3 + $0x4e4] ss:$16 sps:$4 sm:$0xff]   ;;  %v4446_v39 = vld [vmem:[#allocation3 + $0x4e0] ss:$16 sps:$4 sm:$0xff]   ;;  %v4457_v42 = vld [vmem:[#allocation3 + $0x10c] ss:$16 sps:$4 sm:$0xff]  }
  0xe4   : > { %2429 = vmatpush1.bf16.msra.mxu1 %v4368_v43  ;;  %v4454_v41 = vld [vmem:[#allocation3 + $0x504] ss:$16 sps:$4 sm:$0xff]   ;;  %v4452_v43 = vld [vmem:[#allocation3 + $0x500] ss:$16 sps:$4 sm:$0xff]  }
  0xe5   : > { %2470 = vmatpush1.bf16.msra.mxu0 %v4369_v44  ;;  %2430 = vmatprep.subr.bf16.mxu1 %v4370_v45  ;;  %v4455_v44 = vld [vmem:[#allocation3 + $0x108] ss:$16 sps:$4 sm:$0xff]   ;;  %v4460_v45 = vld [vmem:[#allocation3 + $0x524] ss:$16 sps:$4 sm:$0xff]   ;;  %v4458_v47 = vld [vmem:[#allocation3 + $0x520] ss:$16 sps:$4 sm:$0xff]  }
  0xe6   : > { %2471 = vmatprep.subr.bf16.mxu0 %v4372_v46  ;;  %v4463_v46 = vld [vmem:[#allocation3 + $0x12c] ss:$16 sps:$4 sm:$0xff]   ;;  %v4466_v49 = vld [vmem:[#allocation3 + $0x544] ss:$16 sps:$4 sm:$0xff]  }
  0xe8   : > { %2431 = vmatpush1.bf16.msra.mxu1 %v4374_v50  ;;  %v4469_v50 = vld [vmem:[#allocation3 + $0x14c] ss:$16 sps:$4 sm:$0xff]  }
  0xe9   : > { %2472 = vmatpush1.bf16.msra.mxu0 %v4375_v51  ;;  %2432 = vmatprep.subr.bf16.mxu1 %v4376_v53  ;;  %v4464_v51 = vld [vmem:[#allocation3 + $0x540] ss:$16 sps:$4 sm:$0xff]   ;;  %v4467_v53 = vld [vmem:[#allocation3 + $0x148] ss:$16 sps:$4 sm:$0xff]  }
  0xea   : > { %2473 = vmatprep.subr.bf16.mxu0 %v4378_v54  ;;  %v4472_v54 = vld [vmem:[#allocation3 + $0x564] ss:$16 sps:$4 sm:$0xff]  }
  0xec   : > { %2433 = vmatpush1.bf16.msra.mxu1 %v4380_v55  ;;  %v4475_v55 = vld [vmem:[#allocation3 + $0x16c] ss:$16 sps:$4 sm:$0xff]  }
  0xed   : > { %2474 = vmatpush1.bf16.msra.mxu0 %v4381_v56  ;;  %2434 = vmatprep.subr.bf16.mxu1 %v4382_v57  ;;  %v4470_v56 = vld [vmem:[#allocation3 + $0x560] ss:$16 sps:$4 sm:$0xff]   ;;  %v4473_v57 = vld [vmem:[#allocation3 + $0x168] ss:$16 sps:$4 sm:$0xff]  }
  0xee   : > { %2475 = vmatprep.subr.bf16.mxu0 %v4384_v58  ;;  %v4478_v58 = vld [vmem:[#allocation3 + $0x584] ss:$16 sps:$4 sm:$0xff]  }
  0xf0   : > { %2435 = vmatpush1.bf16.msra.mxu1 %v4386_v59  ;;  %v4481_v59 = vld [vmem:[#allocation3 + $0x18c] ss:$16 sps:$4 sm:$0xff]  }
  0xf1   : > { %2476 = vmatpush1.bf16.msra.mxu0 %v4387_v60  ;;  %2436 = vmatprep.subr.bf16.mxu1 %v4388_v61  ;;  %v4476_v60 = vld [vmem:[#allocation3 + $0x580] ss:$16 sps:$4 sm:$0xff]   ;;  %v4479_v61 = vld [vmem:[#allocation3 + $0x188] ss:$16 sps:$4 sm:$0xff]  }
  0xf2   : > { %2477 = vmatprep.subr.bf16.mxu0 %v4390_v62  ;;  %v4484_v62 = vld [vmem:[#allocation3 + $0x5a4] ss:$16 sps:$4 sm:$0xff]  }
  0xf4   : > { %2437 = vmatpush1.bf16.msra.mxu1 %v4392_v63  ;;  %v4487_v63 = vld [vmem:[#allocation3 + $0x1ac] ss:$16 sps:$4 sm:$0xff]  }
  0xf5   : > { %2478 = vmatpush1.bf16.msra.mxu0 %v4393_v0  ;;  %2438 = vmatprep.subr.bf16.mxu1 %v4394_v1  ;;  %v4482_v0 = vld [vmem:[#allocation3 + $0x5a0] ss:$16 sps:$4 sm:$0xff]   ;;  %v4485_v1 = vld [vmem:[#allocation3 + $0x1a8] ss:$16 sps:$4 sm:$0xff]  }
  0xf6   : > { %2479 = vmatprep.subr.bf16.mxu0 %v4396_v2  ;;  %v4490_v2 = vld [vmem:[#allocation3 + $0x5c4] ss:$16 sps:$4 sm:$0xff]  }
  0xf8   : > { %2439 = vmatpush1.bf16.msra.mxu1 %v4398_v3  ;;  %v4493_v3 = vld [vmem:[#allocation3 + $0x1cc] ss:$16 sps:$4 sm:$0xff]  }
  0xf9   : > { %2480 = vmatpush1.bf16.msra.mxu0 %v4399_v4  ;;  %2613 = vmatprep.subr.bf16.mxu1 %v4409_v6  ;;  %v4488_v4 = vld [vmem:[#allocation3 + $0x5c0] ss:$16 sps:$4 sm:$0xff]   ;;  %v4496_v6 = vld [vmem:[#allocation3 + $0x5e4] ss:$16 sps:$4 sm:$0xff]  }
  0xfa   : > { %2490 = vmatprep.subr.bf16.mxu0 %v4406_v5  ;;  %v4491_v5 = vld [vmem:[#allocation3 + $0x1c8] ss:$16 sps:$4 sm:$0xff]  }
  0xfb   : > { %2441 = vmatmul.mubr.bf16.vlgmr.msra.gmra.mrb[0].mxu1 %v5447_v7 }
  0xfc   : > { %2482 = vmatmul.mubr.bf16.vlgmr.msra.gmra.mrb[0].mxu0 %v5449_v8  ;;  %2614 = vmatpush1.bf16.msra.mxu1 %v4407_v10  ;;  %v4494_v10 = vld [vmem:[#allocation3 + $0x5e0] ss:$16 sps:$4 sm:$0xff]  }
  0xfd   : > { %2491 = vmatpush1.bf16.msra.mxu0 %v4404_v9  ;;  %2615 = vmatprep.subr.bf16.mxu1 %v4415_v12  ;;  %v4499_v9 = vld [vmem:[#allocation3 + $0x1ec] ss:$16 sps:$4 sm:$0xff]   ;;  %v4504_v12 = vld [vmem:[#allocation3 + $0x604] ss:$16 sps:$4 sm:$0xff]  }
  0xfe   : > { %2492 = vmatprep.subr.bf16.mxu0 %v4412_v11  ;;  %2645 = vmatprep.mubr.bf16.mxu1 %v5440_v48  ;;  %v4461_v48 = vld [vmem:[#allocation3 + $0x128] ss:$16 sps:$4 sm:$0xff]  }
  0xff   : > { %2522 = vmatprep.mubr.bf16.mxu0 %v5459_v35  ;;  %v4497_v11 = vld [vmem:[#allocation3 + $0x1e8] ss:$16 sps:$4 sm:$0xff]  }
 0x100   : > { %2616 = vmatpush1.bf16.msra.mxu1 %v4413_v14  ;;  %v5464_v14 = vcombine.low %v5455_v33, %v5455_v33  ;;  %v4529_v33 = vld [vmem:[#allocation3 + $0x288] ss:$16 sps:$4 sm:$0xff]  }
 0x101   : > { %2493 = vmatpush1.bf16.msra.mxu0 %v4410_v13  ;;  %2617 = vmatprep.subr.bf16.mxu1 %v4421_v16  ;;  %v4507_v13 = vld [vmem:[#allocation3 + $0x20c] ss:$16 sps:$4 sm:$0xff]   ;;  %v4505_v16 = vld [vmem:[#allocation3 + $0x208] ss:$16 sps:$4 sm:$0xff]  }
 0x102   : > { %2494 = vmatprep.subr.bf16.mxu0 %v4418_v15  ;;  %v4502_v15 = vld [vmem:[#allocation3 + $0x600] ss:$16 sps:$4 sm:$0xff]  }
 0x104   : > { %2618 = vmatpush1.bf16.msra.mxu1 %v4419_v18  ;;  %v4513_v18 = vld [vmem:[#allocation3 + $0x22c] ss:$16 sps:$4 sm:$0xff]  }
 0x105   : > { %2495 = vmatpush1.bf16.msra.mxu0 %v4416_v17  ;;  %2619 = vmatprep.subr.bf16.mxu1 %v4427_v20  ;;  %v4510_v17 = vld [vmem:[#allocation3 + $0x624] ss:$16 sps:$4 sm:$0xff]  }
 0x106   : > { %2496 = vmatprep.subr.bf16.mxu0 %v4424_v19  ;;  %v5467_v19 = vld [vmem:[%s5437_s22 + $0x18] sm:$0xff] }
 0x107   : > { %v5471_v20 = vcombine.high %v5467_v19, %v5467_v19 }
 0x108   : > { %2620 = vmatpush1.bf16.msra.mxu1 %v4425_v22  ;;  %v4511_v22 = vld [vmem:[#allocation3 + $0x228] ss:$16 sps:$4 sm:$0xff]  }
 0x109   : > { %2497 = vmatpush1.bf16.msra.mxu0 %v4422_v21  ;;  %2621 = vmatprep.subr.bf16.mxu1 %v4433_v24  ;;  %v4508_v21 = vld [vmem:[#allocation3 + $0x620] ss:$16 sps:$4 sm:$0xff]   ;;  %v4519_v24 = vld [vmem:[#allocation3 + $0x24c] ss:$16 sps:$4 sm:$0xff]  }
 0x10a   : > { %2498 = vmatprep.subr.bf16.mxu0 %v4430_v23  ;;  %v4516_v23 = vld [vmem:[#allocation3 + $0x644] ss:$16 sps:$4 sm:$0xff]  }
 0x10c   : > { %2622 = vmatpush1.bf16.msra.mxu1 %v4431_v26  ;;  %v4517_v26 = vld [vmem:[#allocation3 + $0x248] ss:$16 sps:$4 sm:$0xff]  }
 0x10d   : > { %2499 = vmatpush1.bf16.msra.mxu0 %v4428_v25  ;;  %2623 = vmatprep.subr.bf16.mxu1 %v4439_v28  ;;  %v4514_v25 = vld [vmem:[#allocation3 + $0x640] ss:$16 sps:$4 sm:$0xff]  }
 0x10e   : > { %2500 = vmatprep.subr.bf16.mxu0 %v4436_v27  ;;  %v4522_v27 = vld [vmem:[#allocation3 + $0x664] ss:$16 sps:$4 sm:$0xff]   ;;  %v4520_v28 = vld [vmem:[#allocation3 + $0x660] ss:$16 sps:$4 sm:$0xff]  }
 0x110   : > { %2624 = vmatpush1.bf16.msra.mxu1 %v4437_v30  ;;  %v4528_v30 = vld [vmem:[#allocation3 + $0x684] ss:$16 sps:$4 sm:$0xff]  }
 0x111   : > { %2501 = vmatpush1.bf16.msra.mxu0 %v4434_v29  ;;  %2625 = vmatprep.subr.bf16.mxu1 %v4445_v32  ;;  %v4523_v29 = vld [vmem:[#allocation3 + $0x268] ss:$16 sps:$4 sm:$0xff]   ;;  %v4526_v32 = vld [vmem:[#allocation3 + $0x680] ss:$16 sps:$4 sm:$0xff]  }
 0x112   : > { %2502 = vmatprep.subr.bf16.mxu0 %v4442_v31  ;;  %v4531_v31 = vld [vmem:[#allocation3 + $0x28c] ss:$16 sps:$4 sm:$0xff]  }
 0x114   : > { %2626 = vmatpush1.bf16.msra.mxu1 %v4443_v36  ;;  %v4532_v36 = vld [vmem:[#allocation3 + $0x6a0] ss:$16 sps:$4 sm:$0xff]  }
 0x115   : > { %2503 = vmatpush1.bf16.msra.mxu0 %v4440_v34  ;;  %2627 = vmatprep.subr.bf16.mxu1 %v4451_v38  ;;  %v4537_v34 = vld [vmem:[#allocation3 + $0x2ac] ss:$16 sps:$4 sm:$0xff]   ;;  %v4540_v38 = vld [vmem:[#allocation3 + $0x6c4] ss:$16 sps:$4 sm:$0xff]  }
 0x116   : > { %2504 = vmatprep.subr.bf16.mxu0 %v4448_v37  ;;  %v4535_v37 = vld [vmem:[#allocation3 + $0x2a8] ss:$16 sps:$4 sm:$0xff]  }
 0x118   : > { %2628 = vmatpush1.bf16.msra.mxu1 %v4449_v40  ;;  %v4538_v40 = vld [vmem:[#allocation3 + $0x6c0] ss:$16 sps:$4 sm:$0xff]  }
 0x119   : > { %2505 = vmatpush1.bf16.msra.mxu0 %v4446_v39  ;;  %2629 = vmatprep.subr.bf16.mxu1 %v4457_v42  ;;  %v4543_v39 = vld [vmem:[#allocation3 + $0x2cc] ss:$16 sps:$4 sm:$0xff]   ;;  %v4546_v42 = vld [vmem:[#allocation3 + $0x6e4] ss:$16 sps:$4 sm:$0xff]  }
 0x11a   : > { %2506 = vmatprep.subr.bf16.mxu0 %v4454_v41  ;;  %v4541_v41 = vld [vmem:[#allocation3 + $0x2c8] ss:$16 sps:$4 sm:$0xff]  }
 0x11c   : > { %2630 = vmatpush1.bf16.msra.mxu1 %v4455_v44  ;;  %v4544_v44 = vld [vmem:[#allocation3 + $0x6e0] ss:$16 sps:$4 sm:$0xff]  }
 0x11d   : > { %2507 = vmatpush1.bf16.msra.mxu0 %v4452_v43  ;;  %2631 = vmatprep.subr.bf16.mxu1 %v4463_v46  ;;  %v4549_v43 = vld [vmem:[#allocation3 + $0x2ec] ss:$16 sps:$4 sm:$0xff]   ;;  %v4552_v46 = vld [vmem:[#allocation3 + $0x704] ss:$16 sps:$4 sm:$0xff]  }
 0x11e   : > { %2508 = vmatprep.subr.bf16.mxu0 %v4460_v45  ;;  %v4547_v45 = vld [vmem:[#allocation3 + $0x2e8] ss:$16 sps:$4 sm:$0xff]  }
 0x120   : > { %2632 = vmatpush1.bf16.msra.mxu1 %v4461_v48  ;;  %v4550_v48 = vld [vmem:[#allocation3 + $0x700] ss:$16 sps:$4 sm:$0xff]  }
 0x121   : > { %2509 = vmatpush1.bf16.msra.mxu0 %v4458_v47  ;;  %2633 = vmatprep.subr.bf16.mxu1 %v4469_v50  ;;  %v4555_v47 = vld [vmem:[#allocation3 + $0x30c] ss:$16 sps:$4 sm:$0xff]   ;;  %v4558_v50 = vld [vmem:[#allocation3 + $0x724] ss:$16 sps:$4 sm:$0xff]  }
 0x122   : > { %2510 = vmatprep.subr.bf16.mxu0 %v4466_v49  ;;  %v4553_v49 = vld [vmem:[#allocation3 + $0x308] ss:$16 sps:$4 sm:$0xff]  }
 0x124   : > { %2634 = vmatpush1.bf16.msra.mxu1 %v4467_v53  ;;  %v4556_v53 = vld [vmem:[#allocation3 + $0x720] ss:$16 sps:$4 sm:$0xff]  }
 0x125   : > { %2511 = vmatpush1.bf16.msra.mxu0 %v4464_v51  ;;  %2635 = vmatprep.subr.bf16.mxu1 %v4475_v55  ;;  %v4561_v51 = vld [vmem:[#allocation3 + $0x32c] ss:$16 sps:$4 sm:$0xff]   ;;  %v4564_v55 = vld [vmem:[#allocation3 + $0x744] ss:$16 sps:$4 sm:$0xff]  }
 0x126   : > { %2512 = vmatprep.subr.bf16.mxu0 %v4472_v54  ;;  %v4559_v54 = vld [vmem:[#allocation3 + $0x328] ss:$16 sps:$4 sm:$0xff]  }
 0x128   : > { %2636 = vmatpush1.bf16.msra.mxu1 %v4473_v57  ;;  %v4562_v57 = vld [vmem:[#allocation3 + $0x740] ss:$16 sps:$4 sm:$0xff]  }
 0x129   : > { %2513 = vmatpush1.bf16.msra.mxu0 %v4470_v56  ;;  %2637 = vmatprep.subr.bf16.mxu1 %v4481_v59  ;;  %v4567_v56 = vld [vmem:[#allocation3 + $0x34c] ss:$16 sps:$4 sm:$0xff]   ;;  %v4570_v59 = vld [vmem:[#allocation3 + $0x764] ss:$16 sps:$4 sm:$0xff]  }
 0x12a   : > { %2514 = vmatprep.subr.bf16.mxu0 %v4478_v58  ;;  %v4565_v58 = vld [vmem:[#allocation3 + $0x348] ss:$16 sps:$4 sm:$0xff]  }
 0x12c   : > { %2638 = vmatpush1.bf16.msra.mxu1 %v4479_v61  ;;  %v4568_v61 = vld [vmem:[#allocation3 + $0x760] ss:$16 sps:$4 sm:$0xff]  }
 0x12d   : > { %2515 = vmatpush1.bf16.msra.mxu0 %v4476_v60  ;;  %2639 = vmatprep.subr.bf16.mxu1 %v4487_v63  ;;  %v4573_v60 = vld [vmem:[#allocation3 + $0x36c] ss:$16 sps:$4 sm:$0xff]   ;;  %v4576_v63 = vld [vmem:[#allocation3 + $0x784] ss:$16 sps:$4 sm:$0xff]  }
 0x12e   : > { %2516 = vmatprep.subr.bf16.mxu0 %v4484_v62  ;;  %v4571_v62 = vld [vmem:[#allocation3 + $0x368] ss:$16 sps:$4 sm:$0xff]  }
 0x130   : > { %2640 = vmatpush1.bf16.msra.mxu1 %v4485_v1  ;;  %v4574_v1 = vld [vmem:[#allocation3 + $0x780] ss:$16 sps:$4 sm:$0xff]  }
 0x131   : > { %2517 = vmatpush1.bf16.msra.mxu0 %v4482_v0  ;;  %2641 = vmatprep.subr.bf16.mxu1 %v4493_v3  ;;  %v4579_v0 = vld [vmem:[#allocation3 + $0x38c] ss:$16 sps:$4 sm:$0xff]   ;;  %v4582_v3 = vld [vmem:[#allocation3 + $0x7a4] ss:$16 sps:$4 sm:$0xff]  }
 0x132   : > { %2518 = vmatprep.subr.bf16.mxu0 %v4490_v2  ;;  %v4577_v2 = vld [vmem:[#allocation3 + $0x388] ss:$16 sps:$4 sm:$0xff]  }
 0x134   : > { %2642 = vmatpush1.bf16.msra.mxu1 %v4491_v5  ;;  %v4580_v5 = vld [vmem:[#allocation3 + $0x7a0] ss:$16 sps:$4 sm:$0xff]  }
 0x135   : > { %2519 = vmatpush1.bf16.msra.mxu0 %v4488_v4  ;;  %2643 = vmatprep.subr.bf16.mxu1 %v4499_v9  ;;  %v4585_v4 = vld [vmem:[#allocation3 + $0x3ac] ss:$16 sps:$4 sm:$0xff]   ;;  %v4588_v9 = vld [vmem:[#allocation3 + $0x7c4] ss:$16 sps:$4 sm:$0xff]  }
 0x136   : > { %2520 = vmatprep.subr.bf16.mxu0 %v4496_v6  ;;  %v4583_v6 = vld [vmem:[#allocation3 + $0x3a8] ss:$16 sps:$4 sm:$0xff]  }
 0x138   : > { %2644 = vmatpush1.bf16.msra.mxu1 %v4497_v11  ;;  %v4586_v11 = vld [vmem:[#allocation3 + $0x7c0] ss:$16 sps:$4 sm:$0xff]  }
 0x139   : > { %2521 = vmatpush1.bf16.msra.mxu0 %v4494_v10  ;;  %2654 = vmatprep.subr.bf16.mxu1 %v4507_v13  ;;  %v4591_v10 = vld [vmem:[#allocation3 + $0x3cc] ss:$16 sps:$4 sm:$0xff]   ;;  %v4594_v13 = vld [vmem:[#allocation3 + $0x7e4] ss:$16 sps:$4 sm:$0xff]  }
 0x13a   : > { %2531 = vmatprep.subr.bf16.mxu0 %v4504_v12  ;;  %v4589_v12 = vld [vmem:[#allocation3 + $0x3c8] ss:$16 sps:$4 sm:$0xff]  }
 0x13b   : > { %2646 = vmatmul.mubr.bf16.vlgmr.msra.gmra.mrb[4].mxu1 %v5447_v7  ;;  %v4525_v7 = vld [vmem:[#allocation3 + $0x26c] ss:$16 sps:$4 sm:$0xff]  }
 0x13c   : > { %2523 = vmatmul.mubr.bf16.vlgmr.msra.gmra.mrb[0].mxu0 %v5464_v14  ;;  %2655 = vmatpush1.bf16.msra.mxu1 %v4505_v16  ;;  %v4592_v16 = vld [vmem:[#allocation3 + $0x7e0] ss:$16 sps:$4 sm:$0xff]  }
 0x13d   : > { %2532 = vmatpush1.bf16.msra.mxu0 %v4502_v15  ;;  %2656 = vmatprep.subr.bf16.mxu1 %v4513_v18  ;;  %v4597_v15 = vld [vmem:[#allocation3 + $0x3ec] ss:$16 sps:$4 sm:$0xff]   ;;  %v4602_v18 = vld [vmem:[#allocation3 + $0x804] ss:$16 sps:$4 sm:$0xff]  }
 0x13e   : > { %2533 = vmatprep.subr.bf16.mxu0 %v4510_v17  ;;  %2563 = vmatprep.mubr.bf16.mxu0 %v5471_v20  ;;  %v4595_v17 = vld [vmem:[#allocation3 + $0x3e8] ss:$16 sps:$4 sm:$0xff]  }
 0x13f   : > { %2686 = vmatprep.mubr.bf16.mxu1 %v5443_v52  ;;  %v4534_v52 = vld [vmem:[#allocation3 + $0x6a4] ss:$16 sps:$4 sm:$0xff]  }
 0x140   : > { %2657 = vmatpush1.bf16.msra.mxu1 %v4511_v22  ;;  %v5479_v22 = vcombine.low %v5467_v19, %v5467_v19  ;;  %v4609_v19 = vld [vmem:[#allocation3 + $0x428] ss:$16 sps:$4 sm:$0xff]  }
 0x141   : > { %2534 = vmatpush1.bf16.msra.mxu0 %v4508_v21  ;;  %2658 = vmatprep.subr.bf16.mxu1 %v4519_v24  ;;  %v4605_v21 = vld [vmem:[#allocation3 + $0x40c] ss:$16 sps:$4 sm:$0xff]   ;;  %v4600_v24 = vld [vmem:[#allocation3 + $0x800] ss:$16 sps:$4 sm:$0xff]  }
 0x142   : > { %2535 = vmatprep.subr.bf16.mxu0 %v4516_v23  ;;  %v5482_v23 = vld [vmem:[%s5437_s22 + $0x20] sm:$0xff] }
 0x144   : > { %2659 = vmatpush1.bf16.msra.mxu1 %v4517_v26  ;;  %v4608_v26 = vld [vmem:[#allocation3 + $0x824] ss:$16 sps:$4 sm:$0xff]  }
 0x145   : > { %2536 = vmatpush1.bf16.msra.mxu0 %v4514_v25  ;;  %2660 = vmatprep.subr.bf16.mxu1 %v4525_v7  ;;  %v4603_v25 = vld [vmem:[#allocation3 + $0x408] ss:$16 sps:$4 sm:$0xff]   ;;  %v4606_v7 = vld [vmem:[#allocation3 + $0x820] ss:$16 sps:$4 sm:$0xff]  }
 0x146   : > { %2537 = vmatprep.subr.bf16.mxu0 %v4522_v27  ;;  %v4611_v27 = vld [vmem:[#allocation3 + $0x42c] ss:$16 sps:$4 sm:$0xff]  }
 0x148   : > { %2661 = vmatpush1.bf16.msra.mxu1 %v4523_v29  ;;  %v4614_v29 = vld [vmem:[#allocation3 + $0x844] ss:$16 sps:$4 sm:$0xff]  }
 0x149   : > { %2538 = vmatpush1.bf16.msra.mxu0 %v4520_v28  ;;  %2662 = vmatprep.subr.bf16.mxu1 %v4531_v31  ;;  %v5486_v28 = vcombine.high %v5482_v23, %v5482_v23  ;;  %v4612_v31 = vld [vmem:[#allocation3 + $0x840] ss:$16 sps:$4 sm:$0xff]  }
 0x14a   : > { %2539 = vmatprep.subr.bf16.mxu0 %v4528_v30  ;;  %v4617_v30 = vld [vmem:[#allocation3 + $0x44c] ss:$16 sps:$4 sm:$0xff]  }
 0x14c   : > { %2663 = vmatpush1.bf16.msra.mxu1 %v4529_v33  ;;  %v4620_v33 = vld [vmem:[#allocation3 + $0x864] ss:$16 sps:$4 sm:$0xff]  }
 0x14d   : > { %2540 = vmatpush1.bf16.msra.mxu0 %v4526_v32  ;;  %2664 = vmatprep.subr.bf16.mxu1 %v4537_v34  ;;  %v4615_v32 = vld [vmem:[#allocation3 + $0x448] ss:$16 sps:$4 sm:$0xff]  }
 0x14e   : > { %2541 = vmatprep.subr.bf16.mxu0 %v4534_v52  ;;  %v4623_v52 = vld [vmem:[#allocation3 + $0x46c] ss:$16 sps:$4 sm:$0xff]   ;;  %v4621_v34 = vld [vmem:[#allocation3 + $0x468] ss:$16 sps:$4 sm:$0xff]  }
 0x150   : > { %2665 = vmatpush1.bf16.msra.mxu1 %v4535_v37  ;;  %v4629_v37 = vld [vmem:[#allocation3 + $0x48c] ss:$16 sps:$4 sm:$0xff]  }
 0x151   : > { %2542 = vmatpush1.bf16.msra.mxu0 %v4532_v36  ;;  %2666 = vmatprep.subr.bf16.mxu1 %v4543_v39  ;;  %v4626_v36 = vld [vmem:[#allocation3 + $0x884] ss:$16 sps:$4 sm:$0xff]   ;;  %v4627_v39 = vld [vmem:[#allocation3 + $0x488] ss:$16 sps:$4 sm:$0xff]  }
 0x152   : > { %2543 = vmatprep.subr.bf16.mxu0 %v4540_v38  ;;  %v4624_v38 = vld [vmem:[#allocation3 + $0x880] ss:$16 sps:$4 sm:$0xff]  }
 0x154   : > { %2667 = vmatpush1.bf16.msra.mxu1 %v4541_v41  ;;  %v4630_v41 = vld [vmem:[#allocation3 + $0x8a0] ss:$16 sps:$4 sm:$0xff]  }
 0x155   : > { %2544 = vmatpush1.bf16.msra.mxu0 %v4538_v40  ;;  %2668 = vmatprep.subr.bf16.mxu1 %v4549_v43  ;;  %v4632_v40 = vld [vmem:[#allocation3 + $0x8a4] ss:$16 sps:$4 sm:$0xff]  }
 0x156   : > { %2545 = vmatprep.subr.bf16.mxu0 %v4546_v42  ;;  %v4633_v42 = vld [vmem:[#allocation3 + $0x4a8] ss:$16 sps:$4 sm:$0xff]   ;;  %v4638_v43 = vld [vmem:[#allocation3 + $0x8c4] ss:$16 sps:$4 sm:$0xff]  }
 0x158   : > { %2669 = vmatpush1.bf16.msra.mxu1 %v4547_v45  ;;  %v4636_v45 = vld [vmem:[#allocation3 + $0x8c0] ss:$16 sps:$4 sm:$0xff]  }
 0x159   : > { %2546 = vmatpush1.bf16.msra.mxu0 %v4544_v44  ;;  %2670 = vmatprep.subr.bf16.mxu1 %v4555_v47  ;;  %v4641_v44 = vld [vmem:[#allocation3 + $0x4cc] ss:$16 sps:$4 sm:$0xff]   ;;  %v4644_v47 = vld [vmem:[#allocation3 + $0x8e4] ss:$16 sps:$4 sm:$0xff]  }
 0x15a   : > { %2547 = vmatprep.subr.bf16.mxu0 %v4552_v46  ;;  %v4639_v46 = vld [vmem:[#allocation3 + $0x4c8] ss:$16 sps:$4 sm:$0xff]  }
 0x15c   : > { %2671 = vmatpush1.bf16.msra.mxu1 %v4553_v49  ;;  %v4642_v49 = vld [vmem:[#allocation3 + $0x8e0] ss:$16 sps:$4 sm:$0xff]  }
 0x15d   : > { %2548 = vmatpush1.bf16.msra.mxu0 %v4550_v48  ;;  %2672 = vmatprep.subr.bf16.mxu1 %v4561_v51  ;;  %v4647_v48 = vld [vmem:[#allocation3 + $0x4ec] ss:$16 sps:$4 sm:$0xff]   ;;  %v4650_v51 = vld [vmem:[#allocation3 + $0x904] ss:$16 sps:$4 sm:$0xff]  }
 0x15e   : > { %2549 = vmatprep.subr.bf16.mxu0 %v4558_v50  ;;  %v4645_v50 = vld [vmem:[#allocation3 + $0x4e8] ss:$16 sps:$4 sm:$0xff]  }
 0x160   : > { %2673 = vmatpush1.bf16.msra.mxu1 %v4559_v54  ;;  %v4648_v54 = vld [vmem:[#allocation3 + $0x900] ss:$16 sps:$4 sm:$0xff]  }
 0x161   : > { %2550 = vmatpush1.bf16.msra.mxu0 %v4556_v53  ;;  %2674 = vmatprep.subr.bf16.mxu1 %v4567_v56  ;;  %v4653_v53 = vld [vmem:[#allocation3 + $0x50c] ss:$16 sps:$4 sm:$0xff]   ;;  %v4656_v56 = vld [vmem:[#allocation3 + $0x924] ss:$16 sps:$4 sm:$0xff]  }
 0x162   : > { %2551 = vmatprep.subr.bf16.mxu0 %v4564_v55  ;;  %v4651_v55 = vld [vmem:[#allocation3 + $0x508] ss:$16 sps:$4 sm:$0xff]  }
 0x164   : > { %2675 = vmatpush1.bf16.msra.mxu1 %v4565_v58  ;;  %v4654_v58 = vld [vmem:[#allocation3 + $0x920] ss:$16 sps:$4 sm:$0xff]  }
 0x165   : > { %2552 = vmatpush1.bf16.msra.mxu0 %v4562_v57  ;;  %2676 = vmatprep.subr.bf16.mxu1 %v4573_v60  ;;  %v4659_v57 = vld [vmem:[#allocation3 + $0x52c] ss:$16 sps:$4 sm:$0xff]   ;;  %v4662_v60 = vld [vmem:[#allocation3 + $0x944] ss:$16 sps:$4 sm:$0xff]  }
 0x166   : > { %2553 = vmatprep.subr.bf16.mxu0 %v4570_v59  ;;  %v4657_v59 = vld [vmem:[#allocation3 + $0x528] ss:$16 sps:$4 sm:$0xff]  }
 0x168   : > { %2677 = vmatpush1.bf16.msra.mxu1 %v4571_v62  ;;  %v4660_v62 = vld [vmem:[#allocation3 + $0x940] ss:$16 sps:$4 sm:$0xff]  }
 0x169   : > { %2554 = vmatpush1.bf16.msra.mxu0 %v4568_v61  ;;  %2678 = vmatprep.subr.bf16.mxu1 %v4579_v0  ;;  %v4665_v61 = vld [vmem:[#allocation3 + $0x54c] ss:$16 sps:$4 sm:$0xff]   ;;  %v4668_v0 = vld [vmem:[#allocation3 + $0x964] ss:$16 sps:$4 sm:$0xff]  }
 0x16a   : > { %2555 = vmatprep.subr.bf16.mxu0 %v4576_v63  ;;  %v4663_v63 = vld [vmem:[#allocation3 + $0x548] ss:$16 sps:$4 sm:$0xff]  }
 0x16c   : > { %2679 = vmatpush1.bf16.msra.mxu1 %v4577_v2  ;;  %v4666_v2 = vld [vmem:[#allocation3 + $0x960] ss:$16 sps:$4 sm:$0xff]  }
 0x16d   : > { %2556 = vmatpush1.bf16.msra.mxu0 %v4574_v1  ;;  %2680 = vmatprep.subr.bf16.mxu1 %v4585_v4  ;;  %v4671_v1 = vld [vmem:[#allocation3 + $0x56c] ss:$16 sps:$4 sm:$0xff]   ;;  %v4674_v4 = vld [vmem:[#allocation3 + $0x984] ss:$16 sps:$4 sm:$0xff]  }
 0x16e   : > { %2557 = vmatprep.subr.bf16.mxu0 %v4582_v3  ;;  %v4669_v3 = vld [vmem:[#allocation3 + $0x568] ss:$16 sps:$4 sm:$0xff]  }
 0x170   : > { %2681 = vmatpush1.bf16.msra.mxu1 %v4583_v6  ;;  %v4672_v6 = vld [vmem:[#allocation3 + $0x980] ss:$16 sps:$4 sm:$0xff]  }
 0x171   : > { %2558 = vmatpush1.bf16.msra.mxu0 %v4580_v5  ;;  %2682 = vmatprep.subr.bf16.mxu1 %v4591_v10  ;;  %v4677_v5 = vld [vmem:[#allocation3 + $0x58c] ss:$16 sps:$4 sm:$0xff]   ;;  %v4680_v10 = vld [vmem:[#allocation3 + $0x9a4] ss:$16 sps:$4 sm:$0xff]  }
 0x172   : > { %2559 = vmatprep.subr.bf16.mxu0 %v4588_v9  ;;  %v4675_v9 = vld [vmem:[#allocation3 + $0x588] ss:$16 sps:$4 sm:$0xff]  }
 0x174   : > { %2683 = vmatpush1.bf16.msra.mxu1 %v4589_v12  ;;  %v4678_v12 = vld [vmem:[#allocation3 + $0x9a0] ss:$16 sps:$4 sm:$0xff]  }
 0x175   : > { %2560 = vmatpush1.bf16.msra.mxu0 %v4586_v11  ;;  %2684 = vmatprep.subr.bf16.mxu1 %v4597_v15  ;;  %v4683_v11 = vld [vmem:[#allocation3 + $0x5ac] ss:$16 sps:$4 sm:$0xff]   ;;  %v4686_v15 = vld [vmem:[#allocation3 + $0x9c4] ss:$16 sps:$4 sm:$0xff]  }
 0x176   : > { %2561 = vmatprep.subr.bf16.mxu0 %v4594_v13  ;;  %v4681_v13 = vld [vmem:[#allocation3 + $0x5a8] ss:$16 sps:$4 sm:$0xff]  }
 0x178   : > { %2685 = vmatpush1.bf16.msra.mxu1 %v4595_v17  ;;  %v4684_v17 = vld [vmem:[#allocation3 + $0x9c0] ss:$16 sps:$4 sm:$0xff]  }
 0x179   : > { %2562 = vmatpush1.bf16.msra.mxu0 %v4592_v16  ;;  %2695 = vmatprep.subr.bf16.mxu1 %v4605_v21  ;;  %v4689_v16 = vld [vmem:[#allocation3 + $0x5cc] ss:$16 sps:$4 sm:$0xff]   ;;  %v4692_v21 = vld [vmem:[#allocation3 + $0x9e4] ss:$16 sps:$4 sm:$0xff]  }
 0x17a   : > { %2572 = vmatprep.subr.bf16.mxu0 %v4602_v18  ;;  %v4687_v18 = vld [vmem:[#allocation3 + $0x5c8] ss:$16 sps:$4 sm:$0xff]  }
 0x17b   : > { %2687 = vmatmul.mubr.bf16.vlgmr.msra.gmra.mrb[4].mxu1 %v5449_v8  ;;  %v4618_v8 = vld [vmem:[#allocation3 + $0x860] ss:$16 sps:$4 sm:$0xff]  }
 0x17c   : > { %2564 = vmatmul.mubr.bf16.vlgmr.msra.gmra.mrb[0].mxu0 %v5479_v22  ;;  %2696 = vmatpush1.bf16.msra.mxu1 %v4603_v25  ;;  %v4690_v25 = vld [vmem:[#allocation3 + $0x9e0] ss:$16 sps:$4 sm:$0xff]  }
 0x17d   : > { %2573 = vmatpush1.bf16.msra.mxu0 %v4600_v24  ;;  %2697 = vmatprep.subr.bf16.mxu1 %v4611_v27  ;;  %v4695_v24 = vld [vmem:[#allocation3 + $0x5ec] ss:$16 sps:$4 sm:$0xff]  }
 0x17e   : > { %2574 = vmatprep.subr.bf16.mxu0 %v4608_v26  ;;  %2604 = vmatprep.mubr.bf16.mxu0 %v5486_v28  ;;  %v4693_v26 = vld [vmem:[#allocation3 + $0x5e8] ss:$16 sps:$4 sm:$0xff]   ;;  %v4700_v27 = vld [vmem:[#allocation3 + $0x60c] ss:$16 sps:$4 sm:$0xff]  }
 0x17f   : > { %2727 = vmatprep.mubr.bf16.mxu1 %v5459_v35  ;;  %v4635_v35 = vld [vmem:[#allocation3 + $0x4ac] ss:$16 sps:$4 sm:$0xff]  }
 0x180   : > { %2698 = vmatpush1.bf16.msra.mxu1 %v4609_v19  ;;  %v4698_v19 = vld [vmem:[#allocation3 + $0x608] ss:$16 sps:$4 sm:$0xff]  }
 0x181   : > { %2575 = vmatpush1.bf16.msra.mxu0 %v4606_v7  ;;  %2699 = vmatprep.subr.bf16.mxu1 %v4617_v30  ;;  %v5494_v7 = vcombine.low %v5482_v23, %v5482_v23  ;;  %v4794_v30 = vld [vmem:[#allocation7] ss:$8 sps:$4 sm:$0xff]   ;;  %v4797_v23 = vld [vmem:[#allocation7 + $0x10] ss:$8 sps:$4 sm:$0xff]  }
 0x182   : > { %2576 = vmatprep.subr.bf16.mxu0 %v4614_v29  ;;  %v4703_v29 = vld [vmem:[#allocation3 + $0x62c] ss:$16 sps:$4 sm:$0xff]  }
 0x184   : > { %2700 = vmatpush1.bf16.msra.mxu1 %v4615_v32  ;;  %v4701_v32 = vld [vmem:[#allocation3 + $0x628] ss:$16 sps:$4 sm:$0xff]  }
 0x185   : > { %2577 = vmatpush1.bf16.msra.mxu0 %v4612_v31  ;;  %2701 = vmatprep.subr.bf16.mxu1 %v4623_v52  ;;  %v4796_v31 = vld [vmem:[#allocation7 + $0x4] ss:$8 sps:$4 sm:$0xff]   ;;  %v4706_v52 = vld [vmem:[#allocation3 + $0x64c] ss:$16 sps:$4 sm:$0xff]  }
 0x186   : > { %2578 = vmatprep.subr.bf16.mxu0 %v4620_v33  ;;  %v4799_v33 = vld [vmem:[#allocation7 + $0x14] ss:$8 sps:$4 sm:$0xff]  }
 0x188   : > { %2702 = vmatpush1.bf16.msra.mxu1 %v4621_v34  ;;  %v4704_v34 = vld [vmem:[#allocation3 + $0x648] ss:$16 sps:$4 sm:$0xff]  }
 0x189   : > { %2579 = vmatpush1.bf16.msra.mxu0 %v4618_v8  ;;  %2703 = vmatprep.subr.bf16.mxu1 %v4629_v37  ;;  %v4802_v8 = vld [vmem:[#allocation7 + $0x24] ss:$8 sps:$4 sm:$0xff]   ;;  %v4805_v37 = vld [vmem:[#allocation7 + $0x34] ss:$8 sps:$4 sm:$0xff]  }
 0x18a   : > { %2580 = vmatprep.subr.bf16.mxu0 %v4626_v36  ;;  %v4709_v36 = vld [vmem:[#allocation3 + $0x66c] ss:$16 sps:$4 sm:$0xff]  }
 0x18c   : > { %2704 = vmatpush1.bf16.msra.mxu1 %v4627_v39  ;;  %v4803_v39 = vld [vmem:[#allocation7 + $0x30] ss:$8 sps:$4 sm:$0xff]  }
 0x18d   : > { %2581 = vmatpush1.bf16.msra.mxu0 %v4624_v38  ;;  %2705 = vmatprep.subr.bf16.mxu1 %v4635_v35  ;;  %v4707_v38 = vld [vmem:[#allocation3 + $0x668] ss:$16 sps:$4 sm:$0xff]  }
 0x18e   : > { %2582 = vmatprep.subr.bf16.mxu0 %v4632_v40  ;;  %v4808_v40 = vld [vmem:[#allocation7 + $0x44] ss:$8 sps:$4 sm:$0xff]  }
 0x18f   : > { %v4710_v35 = vld [vmem:[#allocation3 + $0x688] ss:$16 sps:$4 sm:$0xff]  }
 0x190   : > { %2706 = vmatpush1.bf16.msra.mxu1 %v4633_v42  ;;  %v4806_v42 = vld [vmem:[#allocation7 + $0x40] ss:$8 sps:$4 sm:$0xff]  }
 0x191   : > { %2583 = vmatpush1.bf16.msra.mxu0 %v4630_v41  ;;  %2707 = vmatprep.subr.bf16.mxu1 %v4641_v44  ;;  %v4715_v41 = vld [vmem:[#allocation3 + $0x6ac] ss:$16 sps:$4 sm:$0xff]   ;;  %v4713_v44 = vld [vmem:[#allocation3 + $0x6a8] ss:$16 sps:$4 sm:$0xff]  }
 0x192   : > { %2584 = vmatprep.subr.bf16.mxu0 %v4638_v43  ;;  %v4811_v43 = vld [vmem:[#allocation7 + $0x54] ss:$8 sps:$4 sm:$0xff]  }
 0x194   : > { %2708 = vmatpush1.bf16.msra.mxu1 %v4639_v46 }
 0x195   : > { %2585 = vmatpush1.bf16.msra.mxu0 %v4636_v45  ;;  %2709 = vmatprep.subr.bf16.mxu1 %v4647_v48  ;;  %v4718_v45 = vld [vmem:[#allocation3 + $0x6cc] ss:$16 sps:$4 sm:$0xff]  }
 0x196   : > { %2586 = vmatprep.subr.bf16.mxu0 %v4644_v47  ;;  %v4809_v47 = vld [vmem:[#allocation7 + $0x50] ss:$8 sps:$4 sm:$0xff]  }
 0x198   : > { %2710 = vmatpush1.bf16.msra.mxu1 %v4645_v50 }
 0x199   : > { %2587 = vmatpush1.bf16.msra.mxu0 %v4642_v49  ;;  %2711 = vmatprep.subr.bf16.mxu1 %v4653_v53  ;;  %v4814_v49 = vld [vmem:[#allocation7 + $0x64] ss:$8 sps:$4 sm:$0xff]  }
 0x19a   : > { %2588 = vmatprep.subr.bf16.mxu0 %v4650_v51  ;;  %v4716_v51 = vld [vmem:[#allocation3 + $0x6c8] ss:$16 sps:$4 sm:$0xff]  }
 0x19c   : > { %2712 = vmatpush1.bf16.msra.mxu1 %v4651_v55  ;;  %v4812_v55 = vld [vmem:[#allocation7 + $0x60] ss:$8 sps:$4 sm:$0xff]  }
 0x19d   : > { %2589 = vmatpush1.bf16.msra.mxu0 %v4648_v54  ;;  %2713 = vmatprep.subr.bf16.mxu1 %v4659_v57  ;;  %v4721_v54 = vld [vmem:[#allocation3 + $0x6ec] ss:$16 sps:$4 sm:$0xff]   ;;  %v4719_v57 = vld [vmem:[#allocation3 + $0x6e8] ss:$16 sps:$4 sm:$0xff]  }
 0x19e   : > { %2590 = vmatprep.subr.bf16.mxu0 %v4656_v56  ;;  %v4817_v56 = vld [vmem:[#allocation7 + $0x74] ss:$8 sps:$4 sm:$0xff]  }
 0x1a0   : > { %2714 = vmatpush1.bf16.msra.mxu1 %v4657_v59  ;;  %v4815_v59 = vld [vmem:[#allocation7 + $0x70] ss:$8 sps:$4 sm:$0xff]  }
 0x1a1   : > { %2591 = vmatpush1.bf16.msra.mxu0 %v4654_v58  ;;  %2715 = vmatprep.subr.bf16.mxu1 %v4665_v61  ;;  %v4724_v58 = vld [vmem:[#allocation3 + $0x70c] ss:$16 sps:$4 sm:$0xff]  }
 0x1a2   : > { %2592 = vmatprep.subr.bf16.mxu0 %v4662_v60  ;;  %v4722_v60 = vld [vmem:[#allocation3 + $0x708] ss:$16 sps:$4 sm:$0xff]   ;;  %v4727_v61 = vld [vmem:[#allocation3 + $0x72c] ss:$16 sps:$4 sm:$0xff]  }
 0x1a4   : > { %2716 = vmatpush1.bf16.msra.mxu1 %v4663_v63  ;;  %v4730_v63 = vld [vmem:[#allocation3 + $0x74c] ss:$16 sps:$4 sm:$0xff]  }
 0x1a5   : > { %2593 = vmatpush1.bf16.msra.mxu0 %v4660_v62  ;;  %2717 = vmatprep.subr.bf16.mxu1 %v4671_v1  ;;  %v4725_v62 = vld [vmem:[#allocation3 + $0x728] ss:$16 sps:$4 sm:$0xff]   ;;  %v4733_v1 = vld [vmem:[#allocation3 + $0x76c] ss:$16 sps:$4 sm:$0xff]  }
 0x1a6   : > { %2594 = vmatprep.subr.bf16.mxu0 %v4668_v0  ;;  %v4728_v0 = vld [vmem:[#allocation3 + $0x748] ss:$16 sps:$4 sm:$0xff]  }
 0x1a8   : > { %2718 = vmatpush1.bf16.msra.mxu1 %v4669_v3  ;;  %v4736_v3 = vld [vmem:[#allocation3 + $0x78c] ss:$16 sps:$4 sm:$0xff]  }
 0x1a9   : > { %2595 = vmatpush1.bf16.msra.mxu0 %v4666_v2  ;;  %2719 = vmatprep.subr.bf16.mxu1 %v4677_v5  ;;  %v4731_v2 = vld [vmem:[#allocation3 + $0x768] ss:$16 sps:$4 sm:$0xff]   ;;  %v4739_v5 = vld [vmem:[#allocation3 + $0x7ac] ss:$16 sps:$4 sm:$0xff]  }
 0x1aa   : > { %2596 = vmatprep.subr.bf16.mxu0 %v4674_v4  ;;  %v4734_v4 = vld [vmem:[#allocation3 + $0x788] ss:$16 sps:$4 sm:$0xff]  }
 0x1ac   : > { %2720 = vmatpush1.bf16.msra.mxu1 %v4675_v9  ;;  %v4742_v9 = vld [vmem:[#allocation3 + $0x7cc] ss:$16 sps:$4 sm:$0xff]  }
 0x1ad   : > { %2597 = vmatpush1.bf16.msra.mxu0 %v4672_v6  ;;  %2721 = vmatprep.subr.bf16.mxu1 %v4683_v11  ;;  %v4737_v6 = vld [vmem:[#allocation3 + $0x7a8] ss:$16 sps:$4 sm:$0xff]   ;;  %v4745_v11 = vld [vmem:[#allocation3 + $0x7ec] ss:$16 sps:$4 sm:$0xff]  }
 0x1ae   : > { %2598 = vmatprep.subr.bf16.mxu0 %v4680_v10  ;;  %v4740_v10 = vld [vmem:[#allocation3 + $0x7c8] ss:$16 sps:$4 sm:$0xff]  }
 0x1b0   : > { %2722 = vmatpush1.bf16.msra.mxu1 %v4681_v13  ;;  %v4748_v13 = vld [vmem:[#allocation3 + $0x80c] ss:$16 sps:$4 sm:$0xff]  }
 0x1b1   : > { %2599 = vmatpush1.bf16.msra.mxu0 %v4678_v12  ;;  %2723 = vmatprep.subr.bf16.mxu1 %v4689_v16  ;;  %v4743_v12 = vld [vmem:[#allocation3 + $0x7e8] ss:$16 sps:$4 sm:$0xff]   ;;  %v4751_v16 = vld [vmem:[#allocation3 + $0x82c] ss:$16 sps:$4 sm:$0xff]  }
 0x1b2   : > { %2600 = vmatprep.subr.bf16.mxu0 %v4686_v15  ;;  %v4746_v15 = vld [vmem:[#allocation3 + $0x808] ss:$16 sps:$4 sm:$0xff]  }
 0x1b4   : > { %2724 = vmatpush1.bf16.msra.mxu1 %v4687_v18  ;;  %v4754_v18 = vld [vmem:[#allocation3 + $0x84c] ss:$16 sps:$4 sm:$0xff]  }
 0x1b5   : > { %2601 = vmatpush1.bf16.msra.mxu0 %v4684_v17  ;;  %2725 = vmatprep.subr.bf16.mxu1 %v4695_v24  ;;  %v4749_v17 = vld [vmem:[#allocation3 + $0x828] ss:$16 sps:$4 sm:$0xff]   ;;  %v4757_v24 = vld [vmem:[#allocation3 + $0x86c] ss:$16 sps:$4 sm:$0xff]  }
 0x1b6   : > { %2602 = vmatprep.subr.bf16.mxu0 %v4692_v21  ;;  %v4752_v21 = vld [vmem:[#allocation3 + $0x848] ss:$16 sps:$4 sm:$0xff]  }
 0x1b8   : > { %2726 = vmatpush1.bf16.msra.mxu1 %v4693_v26  ;;  %v4760_v26 = vld [vmem:[#allocation3 + $0x88c] ss:$16 sps:$4 sm:$0xff]  }
 0x1b9   : > { %2603 = vmatpush1.bf16.msra.mxu0 %v4690_v25  ;;  %2736 = vmatprep.subr.bf16.mxu1 %v4700_v27  ;;  %v4755_v25 = vld [vmem:[#allocation3 + $0x868] ss:$16 sps:$4 sm:$0xff]  }
 0x1ba   : > { %3246 = vmatprep.subr.bf16.mxu0 %v4796_v31  ;;  %v4758_v27 = vld [vmem:[#allocation3 + $0x888] ss:$16 sps:$4 sm:$0xff]   ;;  %v4818_v31 = vld [vmem:[#allocation7 + $0x80] ss:$8 sps:$4 sm:$0xff]  }
 0x1bb   : > { %2728 = vmatmul.mubr.bf16.vlgmr.msra.gmra.mrb[4].mxu1 %v5464_v14  ;;  %v4800_v14 = vld [vmem:[#allocation7 + $0x20] ss:$8 sps:$4 sm:$0xff]  }
 0x1bc   : > { %2605 = vmatmul.mubr.bf16.vlgmr.msra.gmra.mrb[0].mxu0 %v5494_v7  ;;  %2737 = vmatpush1.bf16.msra.mxu1 %v4698_v19  ;;  %v4763_v19 = vld [vmem:[#allocation3 + $0x8ac] ss:$16 sps:$4 sm:$0xff]  }
 0x1bd   : > { %2768 = vmatprep.mubr.bf16.mxu1 %v5471_v20  ;;  %2738 = vmatprep.subr.bf16.mxu1 %v4703_v29  ;;  %v4712_v20 = vld [vmem:[#allocation3 + $0x68c] ss:$16 sps:$4 sm:$0xff]  }
 0x1be   : > { %3247 = vmatpush1.bf16.msra.mxu0 %v4794_v30  ;;  %v4766_v29 = vld [vmem:[#allocation3 + $0x8cc] ss:$16 sps:$4 sm:$0xff]   ;;  %v4820_v30 = vld [vmem:[#allocation7 + $0x84] ss:$8 sps:$4 sm:$0xff]  }
 0x1bf   : > { %3248 = vmatprep.subr.bf16.mxu0 %v4799_v33  ;;  %v4823_v33 = vld [vmem:[#allocation7 + $0x94] ss:$8 sps:$4 sm:$0xff]  }
 0x1c0   : > { %2739 = vmatpush1.bf16.msra.mxu1 %v4701_v32  ;;  %v4769_v32 = vld [vmem:[#allocation3 + $0x8ec] ss:$16 sps:$4 sm:$0xff]  }
 0x1c1   : > { %2740 = vmatprep.subr.bf16.mxu1 %v4706_v52  ;;  %v4767_v52 = vld [vmem:[#allocation3 + $0x8e8] ss:$16 sps:$4 sm:$0xff]  }
 0x1c2   : > { %3249 = vmatpush1.bf16.msra.mxu0 %v4797_v23  ;;  %v4821_v23 = vld [vmem:[#allocation7 + $0x90] ss:$8 sps:$4 sm:$0xff]  }
 0x1c3   : > { %3250 = vmatprep.subr.bf16.mxu0 %v4802_v8  ;;  %v4772_v8 = vld [vmem:[#allocation3 + $0x90c] ss:$16 sps:$4 sm:$0xff]  }
 0x1c4   : > { %2741 = vmatpush1.bf16.msra.mxu1 %v4704_v34  ;;  %v4826_v34 = vld [vmem:[#allocation7 + $0xa4] ss:$8 sps:$4 sm:$0xff]  }
 0x1c5   : > { %2742 = vmatprep.subr.bf16.mxu1 %v4709_v36  ;;  %v4770_v36 = vld [vmem:[#allocation3 + $0x908] ss:$16 sps:$4 sm:$0xff]  }
 0x1c6   : > { %3251 = vmatpush1.bf16.msra.mxu0 %v4800_v14  ;;  %v4824_v14 = vld [vmem:[#allocation7 + $0xa0] ss:$8 sps:$4 sm:$0xff]  }
 0x1c7   : > { %3252 = vmatprep.subr.bf16.mxu0 %v4805_v37  ;;  %v4775_v37 = vld [vmem:[#allocation3 + $0x92c] ss:$16 sps:$4 sm:$0xff]  }
 0x1c8   : > { %2743 = vmatpush1.bf16.msra.mxu1 %v4707_v38  ;;  %v4829_v38 = vld [vmem:[#allocation7 + $0xb4] ss:$8 sps:$4 sm:$0xff]  }
 0x1c9   : > { %2744 = vmatprep.subr.bf16.mxu1 %v4712_v20  ;;  %v4773_v20 = vld [vmem:[#allocation3 + $0x928] ss:$16 sps:$4 sm:$0xff]  }
 0x1ca   : > { %3253 = vmatpush1.bf16.msra.mxu0 %v4803_v39  ;;  %v4827_v39 = vld [vmem:[#allocation7 + $0xb0] ss:$8 sps:$4 sm:$0xff]  }
 0x1cb   : > { %3254 = vmatprep.subr.bf16.mxu0 %v4808_v40  ;;  %v4778_v40 = vld [vmem:[#allocation3 + $0x94c] ss:$16 sps:$4 sm:$0xff]  }
 0x1cc   : > { %2745 = vmatpush1.bf16.msra.mxu1 %v4710_v35  ;;  %v4832_v35 = vld [vmem:[#allocation7 + $0xc4] ss:$8 sps:$4 sm:$0xff]  }
 0x1cd   : > { %2746 = vmatprep.subr.bf16.mxu1 %v4715_v41  ;;  %v4776_v41 = vld [vmem:[#allocation3 + $0x948] ss:$16 sps:$4 sm:$0xff]  }
 0x1ce   : > { %v5499_v46 = vpop.f32.mrb[0].mxu1  ;;  %3255 = vmatpush1.bf16.msra.mxu0 %v4806_v42  ;;  %v4830_v42 = vld [vmem:[#allocation7 + $0xc0] ss:$8 sps:$4 sm:$0xff]  }
 0x1cf   : > { %v5501_v48 = vpop.f32.mrb[1].mxu1  ;;  %3256 = vmatprep.subr.bf16.mxu0 %v4811_v43  ;;  %v4781_v43 = vld [vmem:[#allocation3 + $0x96c] ss:$16 sps:$4 sm:$0xff]  }
 0x1d0   : > { %v2446_v50 = vpop.f32.mrb[2].mxu1  ;;  %2747 = vmatpush1.bf16.msra.mxu1 %v4713_v44  ;;  %v4835_v44 = vld [vmem:[#allocation7 + $0xd4] ss:$8 sps:$4 sm:$0xff]  }
 0x1d1   : > { %v2447_v53 = vpop.f32.mrb[3].mxu1  ;;  %2748 = vmatprep.subr.bf16.mxu1 %v4718_v45  ;;  %v4779_v45 = vld [vmem:[#allocation3 + $0x968] ss:$16 sps:$4 sm:$0xff]  }
 0x1d2   : > { %3257 = vmatpush1.bf16.msra.mxu0 %v4809_v47  ;;  %v4833_v47 = vld [vmem:[#allocation7 + $0xd0] ss:$8 sps:$4 sm:$0xff]   ;;  %v4838_v50 = vld [vmem:[#allocation7 + $0xe4] ss:$8 sps:$4 sm:$0xff]   ;;  %v4836_v53 = vld [vmem:[#allocation7 + $0xe0] ss:$8 sps:$4 sm:$0xff]  }
 0x1d3   : > { %3258 = vmatprep.subr.bf16.mxu0 %v4814_v49  ;;  %v4784_v49 = vld [vmem:[#allocation3 + $0x98c] ss:$16 sps:$4 sm:$0xff]  }
 0x1d4   : > { %2749 = vmatpush1.bf16.msra.mxu1 %v4716_v51  ;;  %v4782_v51 = vld [vmem:[#allocation3 + $0x988] ss:$16 sps:$4 sm:$0xff]  }
 0x1d5   : > { %2750 = vmatprep.subr.bf16.mxu1 %v4721_v54  ;;  %v4787_v54 = vld [vmem:[#allocation3 + $0x9ac] ss:$16 sps:$4 sm:$0xff]  }
 0x1d6   : > { %3259 = vmatpush1.bf16.msra.mxu0 %v4812_v55  ;;  %v4841_v55 = vld [vmem:[#allocation7 + $0xf4] ss:$8 sps:$4 sm:$0xff]  }
 0x1d7   : > { %3260 = vmatprep.subr.bf16.mxu0 %v4817_v56  ;;  %v4785_v56 = vld [vmem:[#allocation3 + $0x9a8] ss:$16 sps:$4 sm:$0xff]  }
 0x1d8   : > { %2751 = vmatpush1.bf16.msra.mxu1 %v4719_v57  ;;  %v4839_v57 = vld [vmem:[#allocation7 + $0xf0] ss:$8 sps:$4 sm:$0xff]  }
 0x1d9   : > { %2752 = vmatprep.subr.bf16.mxu1 %v4724_v58  ;;  %v4790_v58 = vld [vmem:[#allocation3 + $0x9cc] ss:$16 sps:$4 sm:$0xff]  }
 0x1da   : > { %3261 = vmatpush1.bf16.msra.mxu0 %v4815_v59  ;;  %v4788_v59 = vld [vmem:[#allocation3 + $0x9c8] ss:$16 sps:$4 sm:$0xff]  }
 0x1db   : > { %3262 = vmatprep.subr.bf16.mxu0 %v4820_v30  ;;  %v4847_v30 = vld [vmem:[#allocation7 + $0x114] ss:$8 sps:$4 sm:$0xff]  }
 0x1dc   : > { %2753 = vmatpush1.bf16.msra.mxu1 %v4722_v60  ;;  %v4793_v60 = vld [vmem:[#allocation3 + $0x9ec] ss:$16 sps:$4 sm:$0xff]  }
 0x1dd   : > { %2754 = vmatprep.subr.bf16.mxu1 %v4727_v61  ;;  %v4844_v61 = vld [vmem:[#allocation7 + $0x104] ss:$8 sps:$4 sm:$0xff]  }
 0x1de   : > { %3263 = vmatpush1.bf16.msra.mxu0 %v4818_v31  ;;  %v4850_v31 = vld [vmem:[#allocation7 + $0x124] ss:$8 sps:$4 sm:$0xff]  }
 0x1df   : > { %3264 = vmatprep.subr.bf16.mxu0 %v4823_v33  ;;  %v4853_v33 = vld [vmem:[#allocation7 + $0x134] ss:$8 sps:$4 sm:$0xff]  }
 0x1e0   : > { %2755 = vmatpush1.bf16.msra.mxu1 %v4725_v62  ;;  %v4791_v62 = vld [vmem:[#allocation3 + $0x9e8] ss:$16 sps:$4 sm:$0xff]  }
 0x1e1   : > { %2756 = vmatprep.subr.bf16.mxu1 %v4730_v63  ;;  %v753_v63 = vlaneseq }
 0x1e2   : > { %3265 = vmatpush1.bf16.msra.mxu0 %v4821_v23  ;;  %v4856_v23 = vld [vmem:[#allocation7 + $0x144] ss:$8 sps:$4 sm:$0xff]  }
 0x1e3   : > { %3266 = vmatprep.subr.bf16.mxu0 %v4826_v34  ;;  %v4859_v34 = vld [vmem:[#allocation7 + $0x154] ss:$8 sps:$4 sm:$0xff]  }
 0x1e4   : > { %2757 = vmatpush1.bf16.msra.mxu1 %v4728_v0  ;;  %v5506_v0 = vshrl.u32 %v753_v63, 7 }
 0x1e5   : > { %2758 = vmatprep.subr.bf16.mxu1 %v4733_v1 }
 0x1e6   : > { %3267 = vmatpush1.bf16.msra.mxu0 %v4824_v14  ;;  %v5509_v1 = vsub.s32 0, %v5506_v0  ;;  %v4862_v14 = vld [vmem:[#allocation7 + $0x164] ss:$8 sps:$4 sm:$0xff]  }
 0x1e7   : > { %3268 = vmatprep.subr.bf16.mxu0 %v4829_v38  ;;  %v4865_v38 = vld [vmem:[#allocation7 + $0x174] ss:$8 sps:$4 sm:$0xff]  }
 0x1e8   : > { %2759 = vmatpush1.bf16.msra.mxu1 %v4731_v2  ;;  %v5511_v2 = vld [vmem:[#allocation5] sm:$0xf] }
 0x1e9   : > { %2760 = vmatprep.subr.bf16.mxu1 %v4736_v3  ;;  %v759_v3 = vsub.s32 1, %v5506_v0 }
 0x1ea   : > { %3269 = vmatpush1.bf16.msra.mxu0 %v4827_v39  ;;  %v4868_v39 = vld [vmem:[#allocation7 + $0x184] ss:$8 sps:$4 sm:$0xff]  }
 0x1eb   : > { %3270 = vmatprep.subr.bf16.mxu0 %v4832_v35  ;;  %v4871_v35 = vld [vmem:[#allocation7 + $0x194] ss:$8 sps:$4 sm:$0xff]  }
 0x1ec   : > { %2761 = vmatpush1.bf16.msra.mxu1 %v4734_v4  ;;  %v756_v4 = vrot.slane %v5511_v2, %v5509_v1 }
 0x1ed   : > { %2762 = vmatprep.subr.bf16.mxu1 %v4739_v5  ;;  %v760_v5 = vrot.slane %v5511_v2, %v759_v3 }
 0x1ee   : > { %3271 = vmatpush1.bf16.msra.mxu0 %v4830_v42  ;;  %v4874_v42 = vld [vmem:[#allocation7 + $0x1a4] ss:$8 sps:$4 sm:$0xff]  }
 0x1ef   : > { %3272 = vmatprep.subr.bf16.mxu0 %v4835_v44  ;;  %v4877_v44 = vld [vmem:[#allocation7 + $0x1b4] ss:$8 sps:$4 sm:$0xff]  }
 0x1f0   : > { %2763 = vmatpush1.bf16.msra.mxu1 %v4737_v6  ;;  %v2443_v6 = vadd.f32 %v5499_v46, %v756_v4 }
 0x1f1   : > { %2764 = vmatprep.subr.bf16.mxu1 %v4742_v9 }
 0x1f2   : > { %3273 = vmatpush1.bf16.msra.mxu0 %v4833_v47  ;;  %v4880_v47 = vld [vmem:[#allocation7 + $0x1c4] ss:$8 sps:$4 sm:$0xff]  }
 0x1f3   : > { %3274 = vmatprep.subr.bf16.mxu0 %v4838_v50  ;;  %v4883_v50 = vld [vmem:[#allocation7 + $0x1d4] ss:$8 sps:$4 sm:$0xff]  }
 0x1f4   : > { %2765 = vmatpush1.bf16.msra.mxu1 %v4740_v10 }
 0x1f5   : > { %2766 = vmatprep.subr.bf16.mxu1 %v4745_v11 }
 0x1f6   : > { %3275 = vmatpush1.bf16.msra.mxu0 %v4836_v53  ;;  %v4886_v53 = vld [vmem:[#allocation7 + $0x1e4] ss:$8 sps:$4 sm:$0xff]  }
 0x1f7   : > { %3276 = vmatprep.subr.bf16.mxu0 %v4841_v55  ;;  %v4889_v55 = vld [vmem:[#allocation7 + $0x1f4] ss:$8 sps:$4 sm:$0xff]  }
 0x1f8   : > { %2767 = vmatpush1.bf16.msra.mxu1 %v4743_v12 }
 0x1f9   : > { %2777 = vmatprep.subr.bf16.mxu1 %v4748_v13 }
 0x1fa   : > { %3277 = vmatpush1.bf16.msra.mxu0 %v4839_v57  ;;  %v763_v57 = vsub.s32 2, %v5506_v0 }
 0x1fb   : > { %2769 = vmatmul.mubr.bf16.vlgmr.msra.gmra.mrb[4].mxu1 %v5479_v22  ;;  %v4761_v22 = vld [vmem:[#allocation3 + $0x8a8] ss:$16 sps:$4 sm:$0xff]   ;;  %3287 = vmatprep.subr.bf16.mxu0 %v4844_v61 }
 0x1fc   : > { %2778 = vmatpush1.bf16.msra.mxu1 %v4746_v15  ;;  %2809 = vmatprep.mubr.bf16.mxu1 %v5486_v28  ;;  %v4764_v28 = vld [vmem:[#allocation3 + $0x8c8] ss:$16 sps:$4 sm:$0xff]  }
 0x1fd   : > { %2779 = vmatprep.subr.bf16.mxu1 %v4751_v16 }
 0x200   : > { %2780 = vmatpush1.bf16.msra.mxu1 %v4749_v17 }
 0x201   : > { %2781 = vmatprep.subr.bf16.mxu1 %v4754_v18 }
 0x204   : > { %2782 = vmatpush1.bf16.msra.mxu1 %v4752_v21 }
 0x205   : > { %2783 = vmatprep.subr.bf16.mxu1 %v4757_v24 }
 0x208   : > { %2784 = vmatpush1.bf16.msra.mxu1 %v4755_v25 }
 0x209   : > { %2785 = vmatprep.subr.bf16.mxu1 %v4760_v26 }
 0x20c   : > { %2786 = vmatpush1.bf16.msra.mxu1 %v4758_v27 }
 0x20d   : > { %2787 = vmatprep.subr.bf16.mxu1 %v4763_v19 }
 0x210   : > { %2788 = vmatpush1.bf16.msra.mxu1 %v4761_v22  ;;  %v4842_v22 = vld [vmem:[#allocation7 + $0x100] ss:$8 sps:$4 sm:$0xff]  }
 0x211   : > { %2789 = vmatprep.subr.bf16.mxu1 %v4766_v29 }
 0x214   : > { %2790 = vmatpush1.bf16.msra.mxu1 %v4764_v28  ;;  %v4845_v28 = vld [vmem:[#allocation7 + $0x110] ss:$8 sps:$4 sm:$0xff]  }
 0x215   : > { %2791 = vmatprep.subr.bf16.mxu1 %v4769_v32  ;;  %v4848_v32 = vld [vmem:[#allocation7 + $0x120] ss:$8 sps:$4 sm:$0xff]  }
 0x218   : > { %2792 = vmatpush1.bf16.msra.mxu1 %v4767_v52  ;;  %v4851_v52 = vld [vmem:[#allocation7 + $0x130] ss:$8 sps:$4 sm:$0xff]  }
 0x219   : > { %2793 = vmatprep.subr.bf16.mxu1 %v4772_v8  ;;  %v4854_v8 = vld [vmem:[#allocation7 + $0x140] ss:$8 sps:$4 sm:$0xff]  }
 0x21c   : > { %2794 = vmatpush1.bf16.msra.mxu1 %v4770_v36  ;;  %v4857_v36 = vld [vmem:[#allocation7 + $0x150] ss:$8 sps:$4 sm:$0xff]  }
 0x21d   : > { %2795 = vmatprep.subr.bf16.mxu1 %v4775_v37  ;;  %v4860_v37 = vld [vmem:[#allocation7 + $0x160] ss:$8 sps:$4 sm:$0xff]  }
 0x220   : > { %2796 = vmatpush1.bf16.msra.mxu1 %v4773_v20  ;;  %v4863_v20 = vld [vmem:[#allocation7 + $0x170] ss:$8 sps:$4 sm:$0xff]  }
 0x221   : > { %2797 = vmatprep.subr.bf16.mxu1 %v4778_v40  ;;  %v4866_v40 = vld [vmem:[#allocation7 + $0x180] ss:$8 sps:$4 sm:$0xff]  }
 0x224   : > { %2798 = vmatpush1.bf16.msra.mxu1 %v4776_v41  ;;  %v4869_v41 = vld [vmem:[#allocation7 + $0x190] ss:$8 sps:$4 sm:$0xff]  }
 0x225   : > { %2799 = vmatprep.subr.bf16.mxu1 %v4781_v43  ;;  %v4872_v43 = vld [vmem:[#allocation7 + $0x1a0] ss:$8 sps:$4 sm:$0xff]  }
 0x228   : > { %2800 = vmatpush1.bf16.msra.mxu1 %v4779_v45  ;;  %v4875_v45 = vld [vmem:[#allocation7 + $0x1b0] ss:$8 sps:$4 sm:$0xff]  }
 0x229   : > { %2801 = vmatprep.subr.bf16.mxu1 %v4784_v49  ;;  %v4878_v49 = vld [vmem:[#allocation7 + $0x1c0] ss:$8 sps:$4 sm:$0xff]  }
 0x22c   : > { %2802 = vmatpush1.bf16.msra.mxu1 %v4782_v51  ;;  %v4881_v51 = vld [vmem:[#allocation7 + $0x1d0] ss:$8 sps:$4 sm:$0xff]  }
 0x22d   : > { %2803 = vmatprep.subr.bf16.mxu1 %v4787_v54  ;;  %v4884_v54 = vld [vmem:[#allocation7 + $0x1e0] ss:$8 sps:$4 sm:$0xff]  }
 0x230   : > { %2804 = vmatpush1.bf16.msra.mxu1 %v4785_v56  ;;  %v4887_v56 = vld [vmem:[#allocation7 + $0x1f0] ss:$8 sps:$4 sm:$0xff]  }
 0x231   : > { %2805 = vmatprep.subr.bf16.mxu1 %v4790_v58  ;;  %v767_v58 = vsub.s32 3, %v5506_v0 }
 0x234   : > { %2806 = vmatpush1.bf16.msra.mxu1 %v4788_v59  ;;  %v764_v59 = vrot.slane %v5511_v2, %v763_v57  ;;  %v4123_v57 = vld [vmem:[#allocation11] ss:$0 sm:$0xff] }
 0x235   : > { %2807 = vmatprep.subr.bf16.mxu1 %v4793_v60  ;;  %v768_v60 = vrot.slane %v5511_v2, %v767_v58 }
 0x238   : > { %2808 = vmatpush1.bf16.msra.mxu1 %v4791_v62 }
 0x23b   : > { %2810 = vmatmul.mubr.bf16.vlgmr.msra.gmra.mrb[4].mxu1 %v5494_v7  ;;  %v2445_v7 = vadd.f32 %v5501_v48, %v760_v5 }
 0x28f   : > { %v2606_v9 = vpop.f32.mrb[0].mxu0 }
 0x290   : > { %v4175_v10 = vadd.f32 %v2606_v9, %v2443_v6  ;;  %v2608_v11 = vpop.f32.mrb[1].mxu0 }
 0x291   : > { %v4177_v12 = vadd.f32 %v2608_v11, %v2445_v7  ;;  %v2610_v13 = vpop.f32.mrb[2].mxu0 }
 0x292   : > { %v4053_v15 = vmul.f32 -1.442695, %v4175_v10  ;;  %v2611_v16 = vpop.f32.mrb[3].mxu0 }
 0x293   : > { %v4054_v17 = vmul.f32 -1.442695, %v4177_v12 }
 0x294   : > { %4906 = vpow2.f32 %v4053_v15 }
 0x295   : > { %4908 = vpow2.f32 %v4054_v17 }
 0x29e   : > { %v4907_v18 = vpop.eup %4906 }
 0x29f   : > { %v4909_v21 = vpop.eup %4908  ;;  %v2830_v24 = vadd.f32 1.0, %v4907_v18 }
 0x2a0   : > { %v2831_v25 = vadd.f32 1.0, %v4909_v21 }
 0x2a1   : > { %4910 = vrcp.f32 %v2830_v24  ;;  %v4890_v24 = vld [vmem:[#allocation10 + $0x40] sm:$0xff]  }
 0x2a2   : > { %4912 = vrcp.f32 %v2831_v25  ;;  %v4891_v25 = vld [vmem:[#allocation10] sm:$0xff]  }
 0x2ab   : > { %v4911_v26 = vpop.eup %4910 }
 0x2ac   : > { %v4913_v46 = vpop.eup %4912  ;;  %v2842_v27 = vmul.f32 %v4911_v26, %v4175_v10  ;;  %v4892_v26 = vld [vmem:[#allocation10 + $0x48] sm:$0xff]  }
 0x2ad   : > { %v2843_v48 = vmul.f32 %v4913_v46, %v4177_v12  ;;  %v4893_v46 = vld [vmem:[#allocation10 + $0x8] sm:$0xff]  }
 0x2ae   : > { %v2846_v29 = vpack.c.bf16 %v2842_v27, %v2842_v27  ;;  %v4894_v27 = vld [vmem:[#allocation10 + $0x50] sm:$0xff]  }
 0x2af   : > { %v2847_v19 = vpack.c.bf16 %v2843_v48, %v2843_v48  ;;  %v4895_v48 = vld [vmem:[#allocation10 + $0x10] sm:$0xff]  }
 0x2b1   : > { %3278 = vmatprep.mubr.bf16.mxu0 %v2847_v19  ;;  %v4896_v19 = vld [vmem:[#allocation10 + $0x58] sm:$0xff]  }
 0x2b2   : > { %3279 = vmatmul.mubr.bf16.vlgmr.msra.gmra.mrb[4].mxu0 %v2846_v29  ;;  %v4898_v29 = vld [vmem:[#allocation10 + $0x60] sm:$0xff]  }
 0x2b3   : > { %3288 = vmatpush1.bf16.msra.mxu0 %v4842_v22  ;;  %v4897_v22 = vld [vmem:[#allocation10 + $0x18] sm:$0xff]  }
 0x2b4   : > { %3289 = vmatprep.subr.bf16.mxu0 %v4847_v30  ;;  %v4899_v30 = vld [vmem:[#allocation10 + $0x20] sm:$0xff]  }
 0x2b7   : > { %3290 = vmatpush1.bf16.msra.mxu0 %v4845_v28  ;;  %v4900_v28 = vld [vmem:[#allocation10 + $0x68] sm:$0xff]  }
 0x2b8   : > { %3291 = vmatprep.subr.bf16.mxu0 %v4850_v31  ;;  %v4901_v31 = vld [vmem:[#allocation10 + $0x28] sm:$0xff]  }
 0x2bb   : > { %3292 = vmatpush1.bf16.msra.mxu0 %v4848_v32  ;;  %v4902_v32 = vld [vmem:[#allocation10 + $0x70] sm:$0xff]  }
 0x2bc   : > { %3293 = vmatprep.subr.bf16.mxu0 %v4853_v33  ;;  %v4903_v33 = vld [vmem:[#allocation10 + $0x30] sm:$0xff]  }
 0x2bf   : > { %3294 = vmatpush1.bf16.msra.mxu0 %v4851_v52  ;;  %v4904_v52 = vld [vmem:[#allocation10 + $0x78] sm:$0xff]  }
 0x2c0   : > { %3295 = vmatprep.subr.bf16.mxu0 %v4856_v23  ;;  %v4905_v23 = vld [vmem:[#allocation10 + $0x38] sm:$0xff]  }
 0x2c3   : > { %3296 = vmatpush1.bf16.msra.mxu0 %v4854_v8  ;;  %v2914_v8 = vld [vmem:[#allocation8] sm:$0x3] }
 0x2c4   : > { %3297 = vmatprep.subr.bf16.mxu0 %v4859_v34  ;;  %v2919_v34 = vrot.slane %v2914_v8, %v5509_v1 }
 0x2c7   : > { %3298 = vmatpush1.bf16.msra.mxu0 %v4857_v36  ;;  %v2923_v36 = vrot.slane %v2914_v8, %v759_v3 }
 0x2c8   : > { %3299 = vmatprep.subr.bf16.mxu0 %v4862_v14 }
 0x2cb   : > { %3300 = vmatpush1.bf16.msra.mxu0 %v4860_v37 }
 0x2cc   : > { %3301 = vmatprep.subr.bf16.mxu0 %v4865_v38 }
 0x2cf   : > { %3302 = vmatpush1.bf16.msra.mxu0 %v4863_v20 }
 0x2d0   : > { %3303 = vmatprep.subr.bf16.mxu0 %v4868_v39 }
 0x2d3   : > { %3304 = vmatpush1.bf16.msra.mxu0 %v4866_v40 }
 0x2d4   : > { %3305 = vmatprep.subr.bf16.mxu0 %v4871_v35 }
 0x2d7   : > { %3306 = vmatpush1.bf16.msra.mxu0 %v4869_v41 }
 0x2d8   : > { %3307 = vmatprep.subr.bf16.mxu0 %v4874_v42 }
 0x2db   : > { %3308 = vmatpush1.bf16.msra.mxu0 %v4872_v43 }
 0x2dc   : > { %3309 = vmatprep.subr.bf16.mxu0 %v4877_v44 }
 0x2df   : > { %3310 = vmatpush1.bf16.msra.mxu0 %v4875_v45 }
 0x2e0   : > { %3311 = vmatprep.subr.bf16.mxu0 %v4880_v47 }
 0x2e3   : > { %3312 = vmatpush1.bf16.msra.mxu0 %v4878_v49 }
 0x2e4   : > { %3313 = vmatprep.subr.bf16.mxu0 %v4883_v50 }
 0x2e7   : > { %3314 = vmatpush1.bf16.msra.mxu0 %v4881_v51 }
 0x2e8   : > { %3315 = vmatprep.subr.bf16.mxu0 %v4886_v53  ;;  %v5171_v53 = vmov 0.0  }
 0x2e9   : > { %4168 = vmatprep.subr.bf16.mxu1 %v5171_v53  ;;  %4170 = vmatprep.mubr.msk.bf16.mxu1 %vm5172_vm0, %v5171_v53 }
 0x2eb   : > { %3316 = vmatpush1.bf16.msra.mxu0 %v4884_v54  ;;  %v3568_v54 = vld [vmem:[#allocation2] sm:$0x1] }
 0x2ec   : > { %3317 = vmatprep.subr.bf16.mxu0 %v4889_v55  ;;  %v5173_v55 = vmov 0  }
 0x2ed   : > { %4303 = vset.pattern.permute.xlu0 %v5173_v55 }
 0x2ee   : > { %3571 = vperm.xlu0 %4303, %v3568_v54  }
 0x2ef   : > { %3318 = vmatpush1.bf16.msra.mxu0 %v4887_v56 }
 0x2f0   : > { %4144 = vmatprep.subr.bf16.mxu0 %v4890_v24 }
 0x30e   : > { %v2811_v61 = vpop.f32.mrb[4].mxu1 }
 0x30f   : > { %v4178_v62 = vadd.f32 %v2811_v61, %v764_v59  ;;  %v2813_v63 = vpop.f32.mrb[5].mxu1 }
 0x310   : > { %v4179_v4 = vadd.f32 %v2813_v63, %v768_v60  ;;  %v2815_v5 = vpop.f32.mrb[6].mxu1 }
 0x311   : > { %v4055_v6 = vmul.f32 -1.442695, %v4178_v62  ;;  %v2816_v7 = vpop.f32.mrb[7].mxu1 }
 0x312   : > { %v4056_v9 = vmul.f32 -1.442695, %v4179_v4 }
 0x313   : > { %4914 = vpow2.f32 %v4055_v6 }
 0x314   : > { %4916 = vpow2.f32 %v4056_v9 }
 0x31d   : > { %v4915_v10 = vpop.eup %4914 }
 0x31e   : > { %v4917_v11 = vpop.eup %4916  ;;  %v2832_v12 = vadd.f32 1.0, %v4915_v10  ;;  %v3526_v10 = vld [vmem:[#allocation13] sm:$0xf] }
 0x31f   : > { %v2833_v13 = vadd.f32 1.0, %v4917_v11 }
 0x320   : > { %4918 = vrcp.f32 %v2832_v12 }
 0x321   : > { %4920 = vrcp.f32 %v2833_v13 }
 0x32a   : > { %v4919_v15 = vpop.eup %4918 }
 0x32b   : > { %v4921_v16 = vpop.eup %4920  ;;  %v2844_v17 = vmul.f32 %v4919_v15, %v4178_v62 }
 0x32c   : > { %v2845_v2 = vmul.f32 %v4921_v16, %v4179_v4 }
 0x32d   : > { %v2848_v21 = vpack.c.bf16 %v2844_v17, %v2844_v17 }
 0x32e   : > { %v2849_v18 = vpack.c.bf16 %v2845_v2, %v2845_v2 }
 0x330   : > { %3319 = vmatprep.mubr.bf16.mxu0 %v2849_v18 }
 0x331   : > { %3320 = vmatmul.mubr.bf16.vlgmr.msra.gmra.mrb[4].mxu0 %v2848_v21 }
 0x332   : > { %4145 = vmatpush3.bf16.msra.mxu0 %v4891_v25 }
 0x333   : > { %4146 = vmatprep.subr.bf16.mxu0 %v4892_v26 }
 0x336   : > { %4147 = vmatpush3.bf16.msra.mxu0 %v4893_v46 }
 0x337   : > { %4148 = vmatprep.subr.bf16.mxu0 %v4894_v27 }
 0x33a   : > { %4149 = vmatpush3.bf16.msra.mxu0 %v4895_v48 }
 0x33b   : > { %4150 = vmatprep.subr.bf16.mxu0 %v4896_v19 }
 0x33e   : > { %4151 = vmatpush3.bf16.msra.mxu0 %v4897_v22 }
 0x33f   : > { %4152 = vmatprep.subr.bf16.mxu0 %v4898_v29 }
 0x342   : > { %4153 = vmatpush3.bf16.msra.mxu0 %v4899_v30 }
 0x343   : > { %4154 = vmatprep.subr.bf16.mxu0 %v4900_v28 }
 0x346   : > { %4155 = vmatpush3.bf16.msra.mxu0 %v4901_v31 }
 0x347   : > { %4156 = vmatprep.subr.bf16.mxu0 %v4902_v32 }
 0x34a   : > { %4157 = vmatpush3.bf16.msra.mxu0 %v4903_v33 }
 0x34b   : > { %4158 = vmatprep.subr.bf16.mxu0 %v4904_v52 }
 0x34e   : > { %4159 = vmatpush3.bf16.msra.mxu0 %v4905_v23 }
 0x36d   : > { %v3572_v11 = vpop.permute.xlu0 %3571 }
 0x36e   : > { %v3577_v12 = vrot.slane %v3572_v11, %v5509_v1 }
 0x404   : > { %v3321_v14 = vpop.f32.mrb[4].mxu0 }
 0x405   : > { %v4180_v37 = vadd.f32 %v3321_v14, %v2919_v34  ;;  %v3323_v38 = vpop.f32.mrb[5].mxu0 }
 0x406   : > { %v4181_v20 = vadd.f32 %v3323_v38, %v2923_v36  ;;  %v3325_v39 = vpop.f32.mrb[6].mxu0 }
 0x407   : > { %v4121_v40 = vmul.f32 -1.442695, %v4180_v37  ;;  %v3326_v35 = vpop.f32.mrb[7].mxu0 }
 0x408   : > { %v4122_v41 = vmul.f32 -1.442695, %v4181_v20 }
 0x409   : > { %4922 = vpow2.f32 %v4121_v40 }
 0x40a   : > { %4924 = vpow2.f32 %v4122_v41 }
 0x413   : > { %v4923_v42 = vpop.eup %4922 }
 0x414   : > { %v4925_v43 = vpop.eup %4924  ;;  %v3334_v44 = vadd.f32 1.0, %v4923_v42 }
 0x415   : > { %v3335_v45 = vadd.f32 1.0, %v4925_v43 }
 0x416   : > { %4926 = vrcp.f32 %v3334_v44 }
 0x417   : > { %4928 = vrcp.f32 %v3335_v45 }
 0x420   : > { %v4927_v47 = vpop.eup %4926 }
 0x421   : > { %v4929_v49 = vpop.eup %4928  ;;  %v3340_v0 = vmul.f32 %v4927_v47, %v4180_v37 }
 0x422   : > { %v3341_v3 = vmul.f32 %v4929_v49, %v4181_v20 }
 0x423   : > { %v3342_v51 = vpack.c.bf16 %v3340_v0, %v3340_v0 }
 0x424   : > { %v3343_v50 = vpack.c.bf16 %v3341_v3, %v3341_v3 }
 0x426   : > { %3511 = vmatprep.mubr.bf16.mxu0 %v3343_v50 }
 0x427   : > { %3512 = vmatmul.mubr.bf16.vlgmr.msra.gmra.mrb[8].mxu0 %v3342_v51 }
 0x4fa   : > { %v4160_v56 = vpop.f32.mrb[8].mxu0 }
 0x4fb   : > { %v4161_v58 = vpop.f32.mrb[9].mxu0 }
 0x4fc   : > { %v4162_v59 = vadd.f32 %v4161_v58, %v4160_v56  ;;  %v4163_v60 = vpop.f32.mrb[10].mxu0 }
 0x4fd   : > { %v4164_v61 = vpop.f32.mrb[11].mxu0 }
 0x4fe   : > { %v3514_v62 = vadd.f32 %v4162_v59, %v4123_v57 }
 0x500   : > { %v4140_v63 = vmul.f32 -1.442695, %v3514_v62 }
 0x502   : > { %4930 = vpow2.f32 %v4140_v63 }
 0x50c   : > { %v4931_v4 = vpop.eup %4930 }
 0x50d   : > { %v3522_v5 = vadd.f32 1.0, %v4931_v4 }
 0x50f   : > { %4932 = vrcp.f32 %v3522_v5 }
 0x519   : > { %v4933_v6 = vpop.eup %4932 }
 0x51a   : > { %v3525_v7 = vmul.f32 %v4933_v6, %v3514_v62 }
 0x51c   : > { %v3527_v9 = vpack.c.bf16 %v3525_v7, %v3525_v7 }
 0x51e   : > { %4169 = vmatpush3.bf16.xpose.msra.mxu1 %v3527_v9 }
 0x525   : > { %4171 = vmatmul.mubr.bf16.vlgmr.msra.gmra.mrb[8].mxu1 %v3526_v10 }
 0x5f8   : > { %v3562_v13 = vpop.f32.mrb[8].mxu1 }
 0x5f9   : > { %v3578_v15 = vadd.f32 %v3577_v12, %v3562_v13  ;;  %v4172_v16 = vpop.f32.mrb[9].mxu1 }
 0x5fa   : > { %v3565_v17 = vpop.f32.mrb[10].mxu1 }
 0x5fb   : > { %v4141_v2 = vmul.f32 -1.442695, %v3578_v15  ;;  %v4173_v18 = vpop.f32.mrb[11].mxu1 }
 0x5fd   : > { %4934 = vpow2.f32 %v4141_v2 }
 0x607   : > { %v4935_v21 = vpop.eup %4934 }
 0x608   : > { %v3582_v24 = vadd.f32 1.0, %v4935_v21 }
 0x60a   : > { %4936 = vrcp.f32 %v3582_v24 }
 0x614   : > { %v4937_v25 = vpop.eup %4936 }
 0x615   : > { %3586 = vst.msk [vmem:[%s424_s21] sm:$0x1] %vm3585_vm1, %v4937_v25 }
 0x616 PF: > { %s25_s11 = sadd.s32 1, %s5156_s11  }
 0x617   : > { %p22_p11 = scmp.ge.s32.totalorder %s25_s11, 4  }
 0x619   :  { %24 = sbr.rel (!%p22_p11) target bundleno = 7 (0x7), region = 115 }
 0x620   :  { %3604 = vsyncpa [#allocation4], 1 }
 0x621   :  { %3606 = vsyncpa [#allocation4 + $0x1], 1 }
 0x622   :  { %3607 = vsyncpa [#allocation6], 1 }
 0x623   :  { %3608 = vsyncpa [#allocation9], 1 }
 0x624   :  { %3609 = vsyncpa [#allocation12], 1 }

</bundles_post_ra>
